<compile_context>
chip_gen: v7x
topology: tpu7x:2x2x1
jax: 0.10.0
libtpu: 0.0.40
codegen_flags: <defaults>
</compile_context>

<pallas_src>
import math
import numpy as np

import jax
import jax.numpy as jnp
from jax.experimental import pallas as pl
from jax.experimental.pallas import tpu as pltpu  # noqa: F401  (no grid/DMA helpers needed at this size)

# ----- hyper-params consistent with the module -----
B = 2            # batch
S = 8            # sequence length
E = 32           # embedding_size
H = 32           # hidden_size (== E so ACT's zeros_like(inputs) matches state)
NUM_LAYERS = 2   # num_layers == max_hop for ACT
NUM_HEADS = 4
DK = 32          # total_key_depth
DV = 32          # total_value_depth
FF = 64          # filter_size
MAX_LENGTH = 64  # (module default 1000; only the first S rows are used)
ACT_THRESHOLD = 1.0 - 0.1
LN_EPS = 1e-6

BS = B * S
HEAD_DK = DK // NUM_HEADS
HEAD_DV = DV // NUM_HEADS

# 128-lane-aligned slots inside the packed matrix slab (64 rows x 640 lanes)
_SLOT = 128
EMB_OFF, QKV_OFF, WO_OFF, W1_OFF, W2_OFF = 0, 128, 256, 384, 512
WMAT_ROWS, WMAT_COLS = 64, 5 * _SLOT
# rows inside the packed vector slab (16 rows x 128 lanes)
R_G1, R_B1, R_G2, R_B2, R_GOUT, R_BOUT, R_FB2, R_PW, R_FB1, R_PB = range(10)
WVEC_ROWS, WVEC_COLS = 16, 128


# ------------------------------------------------------------------ utilities
def gen_timing_signal(length, channels, min_timescale=1.0, max_timescale=1e4):
    """_gen_timing_signal: sinusoidal position signal, shape (1, length, channels)."""
    position = np.arange(length, dtype=np.float64)
    num_timescales = channels // 2
    log_timescale_increment = math.log(float(max_timescale) / float(min_timescale)) / max(
        num_timescales - 1, 1)
    inv_timescales = min_timescale * np.exp(
        np.arange(num_timescales, dtype=np.float64) * -log_timescale_increment)
    scaled_time = position[:, None] * inv_timescales[None, :]
    signal = np.concatenate([np.sin(scaled_time), np.cos(scaled_time)], axis=1)
    signal = np.pad(signal, [[0, 0], [0, channels % 2]], mode="constant")
    return jnp.asarray(signal.reshape(1, length, channels), dtype=jnp.float32)


def init_params(key):
    """Deterministic synthetic parameter init (shapes from the module's __init__)."""
    ks = jax.random.split(key, 8)
    s = 0.05
    return dict(
        emb_w=jax.random.normal(ks[0], (E, H), jnp.float32) * s,     # Linear(E,H,bias=False)
        # ACT_basic: p = Linear(H, 1), bias filled with 1.0
        p_w=jax.random.normal(ks[1], (H, 1), jnp.float32) * s,
        p_b=jnp.ones((1, 1), jnp.float32),
        # EncoderLayer (canonical pre-LN MHA + ReLU FFN; source not given in prompt)
        ln_mha_g=jnp.ones((1, H), jnp.float32),
        ln_mha_b=jnp.zeros((1, H), jnp.float32),
        wq=jax.random.normal(ks[2], (H, DK), jnp.float32) * s,
        wk=jax.random.normal(ks[3], (H, DK), jnp.float32) * s,
        wv=jax.random.normal(ks[4], (H, DV), jnp.float32) * s,
        wo=jax.random.normal(ks[5], (DV, H), jnp.float32) * s,
        ln_ffn_g=jnp.ones((1, H), jnp.float32),
        ln_ffn_b=jnp.zeros((1, H), jnp.float32),
        ffn_w1=jax.random.normal(ks[6], (H, FF), jnp.float32) * s,
        ffn_b1=jnp.zeros((1, FF), jnp.float32),
        ffn_w2=jax.random.normal(ks[7], (FF, H), jnp.float32) * s,
        ffn_b2=jnp.zeros((1, H), jnp.float32),
        # final LayerNorm of the Encoder
        ln_out_g=jnp.ones((1, H), jnp.float32),
        ln_out_b=jnp.zeros((1, H), jnp.float32),
        timing=gen_timing_signal(MAX_LENGTH, H),      # self.timing_signal
        position=gen_timing_signal(NUM_LAYERS, H),    # self.position_signal
    )


# ------------------------------------------------------------------ param packing (wrapper side)
def _pad_to(a, rows, cols):
    return jnp.pad(a, ((0, rows - a.shape[0]), (0, cols - a.shape[1])))


def pack_params(params):
    """Pack ~19 small parameter arrays into two lane/sublane-aligned slabs."""
    scale = HEAD_DK ** -0.5
    # query scaling folded into Wq (exactly equivalent to scaling q post-projection)
    wqkv = jnp.concatenate([params["wq"] * scale, params["wk"], params["wv"]], axis=1)  # (H, 3*DK)
    wmat = jnp.concatenate(
        [
            _pad_to(params["emb_w"], WMAT_ROWS, _SLOT),   # cols   0:128 (uses 0:32)
            _pad_to(wqkv, WMAT_ROWS, _SLOT),              # cols 128:256 (uses 128:224)
            _pad_to(params["wo"], WMAT_ROWS, _SLOT),      # cols 256:384 (uses 256:288)
            _pad_to(params["ffn_w1"], WMAT_ROWS, _SLOT),  # cols 384:512 (uses 384:448)
            _pad_to(params["ffn_w2"], WMAT_ROWS, _SLOT),  # cols 512:640 (uses 512:544)
        ],
        axis=1,
    )  # (64, 640)

    rows = [
        params["ln_mha_g"], params["ln_mha_b"],
        params["ln_ffn_g"], params["ln_ffn_b"],
        params["ln_out_g"], params["ln_out_b"],
        params["ffn_b2"],
        params["p_w"].T,          # (1, H) row for the VPU halting projection
        params["ffn_b1"],         # (1, FF)
        params["p_b"],            # (1, 1)
    ]
    wvec = jnp.concatenate([_pad_to(r, 1, WVEC_COLS) for r in rows], axis=0)  # (10, 128)
    wvec = jnp.pad(wvec, ((0, WVEC_ROWS - wvec.shape[0]), (0, 0)))            # (16, 128)
    return wmat, wvec


# ------------------------------------------------------------------ in-kernel helpers
def _ln(x, g, b, approx=True):
    # Matches the codebase's custom LayerNorm: unbiased std (ddof=1), eps on std.
    mean = jnp.mean(x, axis=-1, keepdims=True)
    var = jnp.sum((x - mean) ** 2, axis=-1, keepdims=True) * (1.0 / (x.shape[-1] - 1))
    inv = pl.reciprocal(jnp.sqrt(var) + LN_EPS, approx=approx)
    return g * (x - mean) * inv + b


# ------------------------------------------------------------------ fused Encoder kernel
def _encoder_kernel(x_ref, tp_ref, wmat_ref, wvec_ref, out_ref):
    bs = x_ref.shape[0]                               # B * S rows, H lanes

    # p-projection row + bias for the ACT gate (VPU path, not an N=1 matmul)
    pw_row = wvec_ref[R_PW:R_PW + 1, 0:H]             # (1, H)
    pb = wvec_ref[R_PB:R_PB + 1, 0:1]                 # (1, 1)

    # x = embedding_proj(input_dropout(inputs))      (dropout p=0 -> identity)
    state = jnp.dot(x_ref[...], wmat_ref[0:E, EMB_OFF:EMB_OFF + H],
                    preferred_element_type=jnp.float32)        # (BS, H)

    prev = jnp.zeros((bs, H), jnp.float32)            # previous_state = zeros_like(inputs); E == H
    halt = jnp.zeros((bs, 1), jnp.float32)
    rem = jnp.zeros((bs, 1), jnp.float32)
    nup = jnp.zeros((bs, 1), jnp.float32)

    # Fixed NUM_LAYERS (== max_hop) iterations; output-equivalent to ACT_basic's
    # data-dependent while loop (see file header).
    for step in range(NUM_LAYERS):
        # state += timing_signal[:, :S, :]; state += position_signal[:, step, :]
        s = state + tp_ref[step]                                           # (BS, H)

        # ---- ACT halting bookkeeping (per token, carried as (BS,1)) ----
        p = jax.nn.sigmoid(jnp.sum(s * pw_row, axis=-1, keepdims=True) + pb)   # (BS, 1)
        still = (halt < 1.0).astype(jnp.float32)
        cand = halt + p * still
        new_halted = (cand > ACT_THRESHOLD).astype(jnp.float32) * still
        still = (cand <= ACT_THRESHOLD).astype(jnp.float32) * still
        halt = halt + p * still
        rem = rem + new_halted * (1.0 - halt)
        halt = halt + new_halted * rem
        nup = nup + still + new_halted
        uw = p * still + new_halted * rem                                   # update_weights

        # ---- state = fn(state): EncoderLayer (pre-LN MHA + pre-LN ReLU FFN) ----
        # TODO(synk): EncoderLayer source not provided; canonical MoEL/UT layer with
        # linear FFN, zero dropout and no mask (mask is never passed in this branch).
        xn = _ln(s, wvec_ref[R_G1:R_G1 + 1, 0:H], wvec_ref[R_B1:R_B1 + 1, 0:H])

        # fused Q|K|V projection (Wq pre-scaled by dk**-0.5 in the wrapper)
        qkv = jnp.dot(xn, wmat_ref[0:H, QKV_OFF:QKV_OFF + 3 * DK],
                      preferred_element_type=jnp.float32)                   # (BS, 3*DK)

        # gather per-(head, batch) tensors: leading axis n = h*B + b
        qh = jnp.concatenate(
            [qkv[:, h * HEAD_DK:(h + 1) * HEAD_DK].reshape(B, S, HEAD_DK)
             for h in range(NUM_HEADS)], axis=0)                            # (NH*B, S, dk)
        kh = jnp.concatenate(
            [qkv[:, DK + h * HEAD_DK:DK + (h + 1) * HEAD_DK].reshape(B, S, HEAD_DK)
             for h in range(NUM_HEADS)], axis=0)
        vh = jnp.concatenate(
            [qkv[:, 2 * DK + h * HEAD_DV:2 * DK + (h + 1) * HEAD_DV].reshape(B, S, HEAD_DV)
             for h in range(NUM_HEADS)], axis=0)

        # one batched logits einsum + ONE softmax + one batched context einsum
        logits = jnp.einsum('nqd,nkd->nqk', qh, kh,
                            preferred_element_type=jnp.float32)             # (NH*B, S, S)
        m = jnp.max(logits, axis=-1, keepdims=True)
        e = jnp.exp(logits - m)
        w = e * pl.reciprocal(jnp.sum(e, axis=-1, keepdims=True), approx=True)
        ctx = jnp.einsum('nqk,nkd->nqd', w, vh,
                         preferred_element_type=jnp.float32)                # (NH*B, S, dv)

        # merge heads back to (BS, DV) and project once through Wo
        ctx2d = jnp.concatenate(
            [ctx[h * B:(h + 1) * B].reshape(bs, HEAD_DV) for h in range(NUM_HEADS)],
            axis=1)                                                          # (BS, DV)
        att = jnp.dot(ctx2d, wmat_ref[0:DV, WO_OFF:WO_OFF + H],
                      preferred_element_type=jnp.float32)                    # (BS, H)

        x1 = s + att
        xn2 = _ln(x1, wvec_ref[R_G2:R_G2 + 1, 0:H], wvec_ref[R_B2:R_B2 + 1, 0:H])
        hid = jnp.maximum(
            jnp.dot(xn2, wmat_ref[0:H, W1_OFF:W1_OFF + FF],
                    preferred_element_type=jnp.float32)
            + wvec_ref[R_FB1:R_FB1 + 1, 0:FF], 0.0)
        y = x1 + jnp.dot(hid, wmat_ref[0:FF, W2_OFF:W2_OFF + H],
                         preferred_element_type=jnp.float32) \
            + wvec_ref[R_FB2:R_FB2 + 1, 0:H]

        # previous_state = state*uw + previous_state*(1-uw)
        prev = y * uw + prev * (1.0 - uw)
        state = y

    # y = layer_norm(previous_state)  (Encoder's final LayerNorm; exact reciprocal)
    y_out = _ln(prev, wvec_ref[R_GOUT:R_GOUT + 1, 0:H], wvec_ref[R_BOUT:R_BOUT + 1, 0:H],
                approx=False)
    # single lane-concatenated output slab: [ y | remainders | n_updates ]
    out_ref[...] = jnp.concatenate([y_out, rem, nup], axis=1)


# ------------------------------------------------------------------ Encoder.forward
def encoder_forward(inputs, mask, params):
    """inputs: (B, S, E) float32; mask: (B, 1, S) bool.
    In the universal+ACT branch the PyTorch module never passes `mask` to the
    EncoderLayer, so it is accepted but unused (matching the source)."""
    del mask
    bsz, seq, emb = inputs.shape
    bs = bsz * seq

    x2d = inputs.reshape(bs, emb)

    # Precompute timing[:, :S, :] + position[:, step, :] once, tiled over batch:
    # tp[step, b*S + s, :] — loop-invariant table loaded into VMEM a single time.
    timing_s = params["timing"][0, :seq, :]                 # (S, H)
    pos = params["position"][0]                             # (NUM_LAYERS, H)
    tp = timing_s[None, :, :] + pos[:, None, :]             # (NUM_LAYERS, S, H)
    tp = jnp.tile(tp, (1, bsz, 1))                          # (NUM_LAYERS, B*S, H)

    wmat, wvec = pack_params(params)                        # 2 weight slabs -> 2 DMAs

    # advisory cost estimate so XLA schedules around this tiny custom call
    flops_step = (2 * bs * H * 3 * DK
                  + 2 * (2 * bsz * NUM_HEADS * seq * seq * HEAD_DK)
                  + 2 * bs * DV * H + 2 * bs * H * FF + 2 * bs * FF * H)
    ce = pl.CostEstimate(
        flops=2 * bs * emb * H + NUM_LAYERS * flops_step,
        transcendentals=NUM_LAYERS * (bsz * NUM_HEADS * seq * seq + 4 * bs) + bs,
        bytes_accessed=4 * (x2d.size + tp.size + wmat.size + wvec.size + bs * (H + 2)),
    )

    out = pl.pallas_call(
        _encoder_kernel,
        out_shape=jax.ShapeDtypeStruct((bs, H + 2), jnp.float32),
        cost_estimate=ce,
    )(x2d, tp, wmat, wvec)

    y = out[:, :H].reshape(bsz, seq, H)
    remainders = out[:, H].reshape(bsz, seq)
    n_updates = out[:, H + 1].reshape(bsz, seq)
    return y, remainders, n_updates


if __name__ == "__main__":
    key = jax.random.PRNGKey(0)
    kp, ki = jax.random.split(key)
    params = init_params(kp)
    inputs = jax.random.normal(ki, (B, S, E), jnp.float32)
    mask = jnp.zeros((B, 1, S), jnp.bool_)   # padding mask (unused in ACT path)

    fwd = jax.jit(encoder_forward)
    y, remainders, n_updates = fwd(inputs, mask, params)
    jax.block_until_ready(y)
    assert y.shape == (B, S, H) and remainders.shape == (B, S) and n_updates.shape == (B, S)
    assert bool(jnp.all(jnp.isfinite(y)))
    assert bool(jnp.all(n_updates >= 1.0))
    print("KERNEL_OK")
</pallas_src>

<mosaic_0001>
module attributes {stable_mosaic.version = 11 : i64} {
  func.func @_encoder_kernel(%arg0: memref<16x32xf32, #tpu.memory_space<vmem>>, %arg1: memref<2x16x32xf32, #tpu.memory_space<vmem>>, %arg2: memref<64x640xf32, #tpu.memory_space<vmem>>, %arg3: memref<16x128xf32, #tpu.memory_space<vmem>>, %arg4: memref<16x34xf32, #tpu.memory_space<vmem>>) attributes {dimension_semantics = [], scalar_prefetch = 0 : i64, scratch_operands = 0 : i64, tpu.core_type = #tpu.core_type<tc>} {
    %c7 = arith.constant 7 : index
    %c0 = arith.constant 0 : index
    %0 = vector.load %arg3[%c7, %c0] : memref<16x128xf32, #tpu.memory_space<vmem>>, vector<1x32xf32>
    %c9 = arith.constant 9 : index
    %c0_0 = arith.constant 0 : index
    %1 = vector.load %arg3[%c9, %c0_0] : memref<16x128xf32, #tpu.memory_space<vmem>>, vector<1x1xf32>
    %c0_1 = arith.constant 0 : index
    %c0_2 = arith.constant 0 : index
    %2 = vector.load %arg0[%c0_1, %c0_2] : memref<16x32xf32, #tpu.memory_space<vmem>>, vector<16x32xf32>
    %c0_3 = arith.constant 0 : index
    %c0_4 = arith.constant 0 : index
    %3 = vector.load %arg2[%c0_3, %c0_4] : memref<64x640xf32, #tpu.memory_space<vmem>>, vector<32x32xf32>
    %cst = arith.constant dense<0.000000e+00> : vector<16x32xf32>
    %4 = tpu.matmul %2, %3, %cst {dimension_numbers = #tpu.dot_dimension_numbers<[1], [0], [0], [1], [0, 0, 1, 1], [], []>} : vector<16x32xf32>, vector<32x32xf32>, vector<16x32xf32> -> vector<16x32xf32>
    %cst_5 = arith.constant 0.000000e+00 : f32
    %5 = vector.broadcast %cst_5 : f32 to vector<16x32xf32>
    %cst_6 = arith.constant 0.000000e+00 : f32
    %6 = vector.broadcast %cst_6 : f32 to vector<16x1xf32>
    %cst_7 = arith.constant 0.000000e+00 : f32
    %7 = vector.broadcast %cst_7 : f32 to vector<16x1xf32>
    %cst_8 = arith.constant 0.000000e+00 : f32
    %8 = vector.broadcast %cst_8 : f32 to vector<16x1xf32>
    %c0_9 = arith.constant 0 : index
    %c0_10 = arith.constant 0 : index
    %c0_11 = arith.constant 0 : index
    %9 = vector.load %arg1[%c0_9, %c0_10, %c0_11] : memref<2x16x32xf32, #tpu.memory_space<vmem>>, vector<1x16x32xf32>
    %10 = vector.shape_cast %9 : vector<1x16x32xf32> to vector<16x32xf32>
    %11 = arith.addf %4, %10 : vector<16x32xf32>
    %12 = vector.broadcast %0 : vector<1x32xf32> to vector<16x32xf32>
    %13 = arith.mulf %11, %12 : vector<16x32xf32>
    %cst_12 = arith.constant dense<0.000000e+00> : vector<16xf32>
    %14 = vector.multi_reduction <add>, %13, %cst_12 [1] : vector<16x32xf32> to vector<16xf32>
    %15 = vector.shape_cast %14 : vector<16xf32> to vector<16x1xf32>
    %16 = vector.broadcast %1 : vector<1x1xf32> to vector<16x1xf32>
    %17 = arith.addf %15, %16 : vector<16x1xf32>
    %18 = arith.negf %17 : vector<16x1xf32>
    %19 = math.exp %18 : vector<16x1xf32>
    %cst_13 = arith.constant 1.000000e+00 : f32
    %20 = vector.broadcast %cst_13 : f32 to vector<16x1xf32>
    %21 = arith.addf %20, %19 : vector<16x1xf32>
    %22 = arith.divf %20, %21 : vector<16x1xf32>
    %cst_14 = arith.constant 1.000000e+00 : f32
    %23 = vector.broadcast %cst_14 : f32 to vector<16x1xf32>
    %24 = arith.cmpf olt, %6, %23 : vector<16x1xf32>
    %25 = arith.extui %24 : vector<16x1xi1> to vector<16x1xi32>
    %26 = arith.sitofp %25 : vector<16x1xi32> to vector<16x1xf32>
    %27 = arith.mulf %22, %26 : vector<16x1xf32>
    %28 = arith.addf %6, %27 : vector<16x1xf32>
    %cst_15 = arith.constant 0.899999976 : f32
    %29 = vector.broadcast %cst_15 : f32 to vector<16x1xf32>
    %30 = arith.cmpf ogt, %28, %29 : vector<16x1xf32>
    %31 = arith.extui %30 : vector<16x1xi1> to vector<16x1xi32>
    %32 = arith.sitofp %31 : vector<16x1xi32> to vector<16x1xf32>
    %33 = arith.mulf %32, %26 : vector<16x1xf32>
    %cst_16 = arith.constant 0.899999976 : f32
    %34 = vector.broadcast %cst_16 : f32 to vector<16x1xf32>
    %35 = arith.cmpf ole, %28, %34 : vector<16x1xf32>
    %36 = arith.extui %35 : vector<16x1xi1> to vector<16x1xi32>
    %37 = arith.sitofp %36 : vector<16x1xi32> to vector<16x1xf32>
    %38 = arith.mulf %37, %26 : vector<16x1xf32>
    %39 = arith.mulf %22, %38 : vector<16x1xf32>
    %40 = arith.addf %6, %39 : vector<16x1xf32>
    %cst_17 = arith.constant 1.000000e+00 : f32
    %41 = vector.broadcast %cst_17 : f32 to vector<16x1xf32>
    %42 = arith.subf %41, %40 : vector<16x1xf32>
    %43 = arith.mulf %33, %42 : vector<16x1xf32>
    %44 = arith.addf %7, %43 : vector<16x1xf32>
    %45 = arith.mulf %33, %44 : vector<16x1xf32>
    %46 = arith.addf %40, %45 : vector<16x1xf32>
    %47 = arith.addf %8, %38 : vector<16x1xf32>
    %48 = arith.addf %47, %33 : vector<16x1xf32>
    %49 = arith.mulf %22, %38 : vector<16x1xf32>
    %50 = arith.mulf %33, %44 : vector<16x1xf32>
    %51 = arith.addf %49, %50 : vector<16x1xf32>
    %c0_18 = arith.constant 0 : index
    %c0_19 = arith.constant 0 : index
    %52 = vector.load %arg3[%c0_18, %c0_19] : memref<16x128xf32, #tpu.memory_space<vmem>>, vector<1x32xf32>
    %c1 = arith.constant 1 : index
    %c0_20 = arith.constant 0 : index
    %53 = vector.load %arg3[%c1, %c0_20] : memref<16x128xf32, #tpu.memory_space<vmem>>, vector<1x32xf32>
    %cst_21 = arith.constant dense<0.000000e+00> : vector<16xf32>
    %54 = vector.multi_reduction <add>, %11, %cst_21 [1] : vector<16x32xf32> to vector<16xf32>
    %55 = vector.shape_cast %54 : vector<16xf32> to vector<16x1xf32>
    %cst_22 = arith.constant 3.200000e+01 : f32
    %56 = vector.broadcast %cst_22 : f32 to vector<16x1xf32>
    %57 = arith.divf %55, %56 : vector<16x1xf32>
    %58 = vector.broadcast %57 : vector<16x1xf32> to vector<16x32xf32>
    %59 = arith.subf %11, %58 : vector<16x32xf32>
    %60 = arith.mulf %59, %59 : vector<16x32xf32>
    %cst_23 = arith.constant dense<0.000000e+00> : vector<16xf32>
    %61 = vector.multi_reduction <add>, %60, %cst_23 [1] : vector<16x32xf32> to vector<16xf32>
    %62 = vector.shape_cast %61 : vector<16xf32> to vector<16x1xf32>
    %cst_24 = arith.constant 0.0322580636 : f32
    %63 = vector.broadcast %cst_24 : f32 to vector<16x1xf32>
    %64 = arith.mulf %62, %63 : vector<16x1xf32>
    %65 = math.sqrt %64 : vector<16x1xf32>
    %cst_25 = arith.constant 9.99999997E-7 : f32
    %66 = vector.broadcast %cst_25 : f32 to vector<16x1xf32>
    %67 = arith.addf %65, %66 : vector<16x1xf32>
    %68 = tpu.reciprocal %67 {approx = true} : vector<16x1xf32> -> vector<16x1xf32>
    %69 = vector.broadcast %57 : vector<16x1xf32> to vector<16x32xf32>
    %70 = arith.subf %11, %69 : vector<16x32xf32>
    %71 = vector.broadcast %52 : vector<1x32xf32> to vector<16x32xf32>
    %72 = arith.mulf %71, %70 : vector<16x32xf32>
    %73 = vector.broadcast %68 : vector<16x1xf32> to vector<16x32xf32>
    %74 = arith.mulf %72, %73 : vector<16x32xf32>
    %75 = vector.broadcast %53 : vector<1x32xf32> to vector<16x32xf32>
    %76 = arith.addf %74, %75 : vector<16x32xf32>
    %c0_26 = arith.constant 0 : index
    %c128 = arith.constant 128 : index
    %77 = vector.load %arg2[%c0_26, %c128] : memref<64x640xf32, #tpu.memory_space<vmem>>, vector<32x96xf32>
    %cst_27 = arith.constant dense<0.000000e+00> : vector<16x96xf32>
    %78 = tpu.matmul %76, %77, %cst_27 {dimension_numbers = #tpu.dot_dimension_numbers<[1], [0], [0], [1], [0, 0, 1, 1], [], []>} : vector<16x32xf32>, vector<32x96xf32>, vector<16x96xf32> -> vector<16x96xf32>
    %79 = vector.extract_strided_slice %78 {offsets = [0, 0], sizes = [16, 8], strides = [1, 1]} : vector<16x96xf32> to vector<16x8xf32>
    %80 = vector.shape_cast %79 : vector<16x8xf32> to vector<2x8x8xf32>
    %81 = vector.extract_strided_slice %78 {offsets = [0, 8], sizes = [16, 8], strides = [1, 1]} : vector<16x96xf32> to vector<16x8xf32>
    %82 = vector.shape_cast %81 : vector<16x8xf32> to vector<2x8x8xf32>
    %83 = vector.extract_strided_slice %78 {offsets = [0, 16], sizes = [16, 8], strides = [1, 1]} : vector<16x96xf32> to vector<16x8xf32>
    %84 = vector.shape_cast %83 : vector<16x8xf32> to vector<2x8x8xf32>
    %85 = vector.extract_strided_slice %78 {offsets = [0, 24], sizes = [16, 8], strides = [1, 1]} : vector<16x96xf32> to vector<16x8xf32>
    %86 = vector.shape_cast %85 : vector<16x8xf32> to vector<2x8x8xf32>
    %87 = tpu.concatenate %80, %82, %84, %86 in 0 : vector<2x8x8xf32>, vector<2x8x8xf32>, vector<2x8x8xf32>, vector<2x8x8xf32> -> vector<8x8x8xf32>
    %88 = vector.extract_strided_slice %78 {offsets = [0, 32], sizes = [16, 8], strides = [1, 1]} : vector<16x96xf32> to vector<16x8xf32>
    %89 = vector.shape_cast %88 : vector<16x8xf32> to vector<2x8x8xf32>
    %90 = vector.extract_strided_slice %78 {offsets = [0, 40], sizes = [16, 8], strides = [1, 1]} : vector<16x96xf32> to vector<16x8xf32>
    %91 = vector.shape_cast %90 : vector<16x8xf32> to vector<2x8x8xf32>
    %92 = vector.extract_strided_slice %78 {offsets = [0, 48], sizes = [16, 8], strides = [1, 1]} : vector<16x96xf32> to vector<16x8xf32>
    %93 = vector.shape_cast %92 : vector<16x8xf32> to vector<2x8x8xf32>
    %94 = vector.extract_strided_slice %78 {offsets = [0, 56], sizes = [16, 8], strides = [1, 1]} : vector<16x96xf32> to vector<16x8xf32>
    %95 = vector.shape_cast %94 : vector<16x8xf32> to vector<2x8x8xf32>
    %96 = tpu.concatenate %89, %91, %93, %95 in 0 : vector<2x8x8xf32>, vector<2x8x8xf32>, vector<2x8x8xf32>, vector<2x8x8xf32> -> vector<8x8x8xf32>
    %97 = vector.extract_strided_slice %78 {offsets = [0, 64], sizes = [16, 8], strides = [1, 1]} : vector<16x96xf32> to vector<16x8xf32>
    %98 = vector.shape_cast %97 : vector<16x8xf32> to vector<2x8x8xf32>
    %99 = vector.extract_strided_slice %78 {offsets = [0, 72], sizes = [16, 8], strides = [1, 1]} : vector<16x96xf32> to vector<16x8xf32>
    %100 = vector.shape_cast %99 : vector<16x8xf32> to vector<2x8x8xf32>
    %101 = vector.extract_strided_slice %78 {offsets = [0, 80], sizes = [16, 8], strides = [1, 1]} : vector<16x96xf32> to vector<16x8xf32>
    %102 = vector.shape_cast %101 : vector<16x8xf32> to vector<2x8x8xf32>
    %103 = vector.extract_strided_slice %78 {offsets = [0, 88], sizes = [16, 8], strides = [1, 1]} : vector<16x96xf32> to vector<16x8xf32>
    %104 = vector.shape_cast %103 : vector<16x8xf32> to vector<2x8x8xf32>
    %105 = tpu.concatenate %98, %100, %102, %104 in 0 : vector<2x8x8xf32>, vector<2x8x8xf32>, vector<2x8x8xf32>, vector<2x8x8xf32> -> vector<8x8x8xf32>
    "tpu.trace_start"() <{level = 10 : i32, message = "nqd,nkd->nqk"}> : () -> ()
    %cst_28 = arith.constant dense<0.000000e+00> : vector<8x8x8xf32>
    %106 = tpu.matmul %87, %96, %cst_28 {dimension_numbers = #tpu.dot_dimension_numbers<[2], [2], [1], [1], [0, 0, 0, 1, 1, 1], [0], [0]>} : vector<8x8x8xf32>, vector<8x8x8xf32>, vector<8x8x8xf32> -> vector<8x8x8xf32>
    "tpu.trace_stop"() : () -> ()
    %cst_29 = arith.constant dense<0xFF800000> : vector<8x8xf32>
    %107 = vector.multi_reduction <maximumf>, %106, %cst_29 [2] : vector<8x8x8xf32> to vector<8x8xf32>
    %108 = vector.shape_cast %107 : vector<8x8xf32> to vector<8x8x1xf32>
    %109 = vector.broadcast %108 : vector<8x8x1xf32> to vector<8x8x8xf32>
    %110 = arith.subf %106, %109 : vector<8x8x8xf32>
    %111 = math.exp %110 : vector<8x8x8xf32>
    %cst_30 = arith.constant dense<0.000000e+00> : vector<8x8xf32>
    %112 = vector.multi_reduction <add>, %111, %cst_30 [2] : vector<8x8x8xf32> to vector<8x8xf32>
    %113 = vector.shape_cast %112 : vector<8x8xf32> to vector<8x8x1xf32>
    %114 = tpu.reciprocal %113 {approx = true} : vector<8x8x1xf32> -> vector<8x8x1xf32>
    %115 = vector.broadcast %114 : vector<8x8x1xf32> to vector<8x8x8xf32>
    %116 = arith.mulf %111, %115 : vector<8x8x8xf32>
    "tpu.trace_start"() <{level = 10 : i32, message = "nqk,nkd->nqd"}> : () -> ()
    %cst_31 = arith.constant dense<0.000000e+00> : vector<8x8x8xf32>
    %117 = tpu.matmul %116, %105, %cst_31 {dimension_numbers = #tpu.dot_dimension_numbers<[2], [1], [1], [2], [0, 0, 0, 1, 1, 2], [0], [0]>} : vector<8x8x8xf32>, vector<8x8x8xf32>, vector<8x8x8xf32> -> vector<8x8x8xf32>
    "tpu.trace_stop"() : () -> ()
    %118 = vector.extract_strided_slice %117 {offsets = [0, 0, 0], sizes = [2, 8, 8], strides = [1, 1, 1]} : vector<8x8x8xf32> to vector<2x8x8xf32>
    %119 = vector.shape_cast %118 : vector<2x8x8xf32> to vector<16x8xf32>
    %120 = vector.extract_strided_slice %117 {offsets = [2, 0, 0], sizes = [2, 8, 8], strides = [1, 1, 1]} : vector<8x8x8xf32> to vector<2x8x8xf32>
    %121 = vector.shape_cast %120 : vector<2x8x8xf32> to vector<16x8xf32>
    %122 = vector.extract_strided_slice %117 {offsets = [4, 0, 0], sizes = [2, 8, 8], strides = [1, 1, 1]} : vector<8x8x8xf32> to vector<2x8x8xf32>
    %123 = vector.shape_cast %122 : vector<2x8x8xf32> to vector<16x8xf32>
    %124 = vector.extract_strided_slice %117 {offsets = [6, 0, 0], sizes = [2, 8, 8], strides = [1, 1, 1]} : vector<8x8x8xf32> to vector<2x8x8xf32>
    %125 = vector.shape_cast %124 : vector<2x8x8xf32> to vector<16x8xf32>
    %126 = tpu.concatenate %119, %121, %123, %125 in 1 : vector<16x8xf32>, vector<16x8xf32>, vector<16x8xf32>, vector<16x8xf32> -> vector<16x32xf32>
    %c0_32 = arith.constant 0 : index
    %c256 = arith.constant 256 : index
    %127 = vector.load %arg2[%c0_32, %c256] : memref<64x640xf32, #tpu.memory_space<vmem>>, vector<32x32xf32>
    %cst_33 = arith.constant dense<0.000000e+00> : vector<16x32xf32>
    %128 = tpu.matmul %126, %127, %cst_33 {dimension_numbers = #tpu.dot_dimension_numbers<[1], [0], [0], [1], [0, 0, 1, 1], [], []>} : vector<16x32xf32>, vector<32x32xf32>, vector<16x32xf32> -> vector<16x32xf32>
    %129 = arith.addf %11, %128 : vector<16x32xf32>
    %c2 = arith.constant 2 : index
    %c0_34 = arith.constant 0 : index
    %130 = vector.load %arg3[%c2, %c0_34] : memref<16x128xf32, #tpu.memory_space<vmem>>, vector<1x32xf32>
    %c3 = arith.constant 3 : index
    %c0_35 = arith.constant 0 : index
    %131 = vector.load %arg3[%c3, %c0_35] : memref<16x128xf32, #tpu.memory_space<vmem>>, vector<1x32xf32>
    %cst_36 = arith.constant dense<0.000000e+00> : vector<16xf32>
    %132 = vector.multi_reduction <add>, %129, %cst_36 [1] : vector<16x32xf32> to vector<16xf32>
    %133 = vector.shape_cast %132 : vector<16xf32> to vector<16x1xf32>
    %cst_37 = arith.constant 3.200000e+01 : f32
    %134 = vector.broadcast %cst_37 : f32 to vector<16x1xf32>
    %135 = arith.divf %133, %134 : vector<16x1xf32>
    %136 = vector.broadcast %135 : vector<16x1xf32> to vector<16x32xf32>
    %137 = arith.subf %129, %136 : vector<16x32xf32>
    %138 = arith.mulf %137, %137 : vector<16x32xf32>
    %cst_38 = arith.constant dense<0.000000e+00> : vector<16xf32>
    %139 = vector.multi_reduction <add>, %138, %cst_38 [1] : vector<16x32xf32> to vector<16xf32>
    %140 = vector.shape_cast %139 : vector<16xf32> to vector<16x1xf32>
    %cst_39 = arith.constant 0.0322580636 : f32
    %141 = vector.broadcast %cst_39 : f32 to vector<16x1xf32>
    %142 = arith.mulf %140, %141 : vector<16x1xf32>
    %143 = math.sqrt %142 : vector<16x1xf32>
    %cst_40 = arith.constant 9.99999997E-7 : f32
    %144 = vector.broadcast %cst_40 : f32 to vector<16x1xf32>
    %145 = arith.addf %143, %144 : vector<16x1xf32>
    %146 = tpu.reciprocal %145 {approx = true} : vector<16x1xf32> -> vector<16x1xf32>
    %147 = vector.broadcast %135 : vector<16x1xf32> to vector<16x32xf32>
    %148 = arith.subf %129, %147 : vector<16x32xf32>
    %149 = vector.broadcast %130 : vector<1x32xf32> to vector<16x32xf32>
    %150 = arith.mulf %149, %148 : vector<16x32xf32>
    %151 = vector.broadcast %146 : vector<16x1xf32> to vector<16x32xf32>
    %152 = arith.mulf %150, %151 : vector<16x32xf32>
    %153 = vector.broadcast %131 : vector<1x32xf32> to vector<16x32xf32>
    %154 = arith.addf %152, %153 : vector<16x32xf32>
    %c0_41 = arith.constant 0 : index
    %c384 = arith.constant 384 : index
    %155 = vector.load %arg2[%c0_41, %c384] : memref<64x640xf32, #tpu.memory_space<vmem>>, vector<32x64xf32>
    %cst_42 = arith.constant dense<0.000000e+00> : vector<16x64xf32>
    %156 = tpu.matmul %154, %155, %cst_42 {dimension_numbers = #tpu.dot_dimension_numbers<[1], [0], [0], [1], [0, 0, 1, 1], [], []>} : vector<16x32xf32>, vector<32x64xf32>, vector<16x64xf32> -> vector<16x64xf32>
    %c8 = arith.constant 8 : index
    %c0_43 = arith.constant 0 : index
    %157 = vector.load %arg3[%c8, %c0_43] : memref<16x128xf32, #tpu.memory_space<vmem>>, vector<1x64xf32>
    %158 = vector.broadcast %157 : vector<1x64xf32> to vector<16x64xf32>
    %159 = arith.addf %156, %158 : vector<16x64xf32>
    %cst_44 = arith.constant 0.000000e+00 : f32
    %160 = vector.broadcast %cst_44 : f32 to vector<16x64xf32>
    %161 = arith.maximumf %159, %160 : vector<16x64xf32>
    %c0_45 = arith.constant 0 : index
    %c512 = arith.constant 512 : index
    %162 = vector.load %arg2[%c0_45, %c512] : memref<64x640xf32, #tpu.memory_space<vmem>>, vector<64x32xf32>
    %cst_46 = arith.constant dense<0.000000e+00> : vector<16x32xf32>
    %163 = tpu.matmul %161, %162, %cst_46 {dimension_numbers = #tpu.dot_dimension_numbers<[1], [0], [0], [1], [0, 0, 1, 1], [], []>} : vector<16x64xf32>, vector<64x32xf32>, vector<16x32xf32> -> vector<16x32xf32>
    %164 = arith.addf %129, %163 : vector<16x32xf32>
    %c6 = arith.constant 6 : index
    %c0_47 = arith.constant 0 : index
    %165 = vector.load %arg3[%c6, %c0_47] : memref<16x128xf32, #tpu.memory_space<vmem>>, vector<1x32xf32>
    %166 = vector.broadcast %165 : vector<1x32xf32> to vector<16x32xf32>
    %167 = arith.addf %164, %166 : vector<16x32xf32>
    %168 = vector.broadcast %51 : vector<16x1xf32> to vector<16x32xf32>
    %169 = arith.mulf %167, %168 : vector<16x32xf32>
    %cst_48 = arith.constant 1.000000e+00 : f32
    %170 = vector.broadcast %cst_48 : f32 to vector<16x1xf32>
    %171 = arith.subf %170, %51 : vector<16x1xf32>
    %172 = vector.broadcast %171 : vector<16x1xf32> to vector<16x32xf32>
    %173 = arith.mulf %5, %172 : vector<16x32xf32>
    %174 = arith.addf %169, %173 : vector<16x32xf32>
    %c1_49 = arith.constant 1 : index
    %c0_50 = arith.constant 0 : index
    %c0_51 = arith.constant 0 : index
    %175 = vector.load %arg1[%c1_49, %c0_50, %c0_51] : memref<2x16x32xf32, #tpu.memory_space<vmem>>, vector<1x16x32xf32>
    %176 = vector.shape_cast %175 : vector<1x16x32xf32> to vector<16x32xf32>
    %177 = arith.addf %167, %176 : vector<16x32xf32>
    %178 = vector.broadcast %0 : vector<1x32xf32> to vector<16x32xf32>
    %179 = arith.mulf %177, %178 : vector<16x32xf32>
    %cst_52 = arith.constant dense<0.000000e+00> : vector<16xf32>
    %180 = vector.multi_reduction <add>, %179, %cst_52 [1] : vector<16x32xf32> to vector<16xf32>
    %181 = vector.shape_cast %180 : vector<16xf32> to vector<16x1xf32>
    %182 = vector.broadcast %1 : vector<1x1xf32> to vector<16x1xf32>
    %183 = arith.addf %181, %182 : vector<16x1xf32>
    %184 = arith.negf %183 : vector<16x1xf32>
    %185 = math.exp %184 : vector<16x1xf32>
    %cst_53 = arith.constant 1.000000e+00 : f32
    %186 = vector.broadcast %cst_53 : f32 to vector<16x1xf32>
    %187 = arith.addf %186, %185 : vector<16x1xf32>
    %188 = arith.divf %186, %187 : vector<16x1xf32>
    %cst_54 = arith.constant 1.000000e+00 : f32
    %189 = vector.broadcast %cst_54 : f32 to vector<16x1xf32>
    %190 = arith.cmpf olt, %46, %189 : vector<16x1xf32>
    %191 = arith.extui %190 : vector<16x1xi1> to vector<16x1xi32>
    %192 = arith.sitofp %191 : vector<16x1xi32> to vector<16x1xf32>
    %193 = arith.mulf %188, %192 : vector<16x1xf32>
    %194 = arith.addf %46, %193 : vector<16x1xf32>
    %cst_55 = arith.constant 0.899999976 : f32
    %195 = vector.broadcast %cst_55 : f32 to vector<16x1xf32>
    %196 = arith.cmpf ogt, %194, %195 : vector<16x1xf32>
    %197 = arith.extui %196 : vector<16x1xi1> to vector<16x1xi32>
    %198 = arith.sitofp %197 : vector<16x1xi32> to vector<16x1xf32>
    %199 = arith.mulf %198, %192 : vector<16x1xf32>
    %cst_56 = arith.constant 0.899999976 : f32
    %200 = vector.broadcast %cst_56 : f32 to vector<16x1xf32>
    %201 = arith.cmpf ole, %194, %200 : vector<16x1xf32>
    %202 = arith.extui %201 : vector<16x1xi1> to vector<16x1xi32>
    %203 = arith.sitofp %202 : vector<16x1xi32> to vector<16x1xf32>
    %204 = arith.mulf %203, %192 : vector<16x1xf32>
    %205 = arith.mulf %188, %204 : vector<16x1xf32>
    %206 = arith.addf %46, %205 : vector<16x1xf32>
    %cst_57 = arith.constant 1.000000e+00 : f32
    %207 = vector.broadcast %cst_57 : f32 to vector<16x1xf32>
    %208 = arith.subf %207, %206 : vector<16x1xf32>
    %209 = arith.mulf %199, %208 : vector<16x1xf32>
    %210 = arith.addf %44, %209 : vector<16x1xf32>
    %211 = arith.addf %48, %204 : vector<16x1xf32>
    %212 = arith.addf %211, %199 : vector<16x1xf32>
    %213 = arith.mulf %188, %204 : vector<16x1xf32>
    %214 = arith.mulf %199, %210 : vector<16x1xf32>
    %215 = arith.addf %213, %214 : vector<16x1xf32>
    %c0_58 = arith.constant 0 : index
    %c0_59 = arith.constant 0 : index
    %216 = vector.load %arg3[%c0_58, %c0_59] : memref<16x128xf32, #tpu.memory_space<vmem>>, vector<1x32xf32>
    %c1_60 = arith.constant 1 : index
    %c0_61 = arith.constant 0 : index
    %217 = vector.load %arg3[%c1_60, %c0_61] : memref<16x128xf32, #tpu.memory_space<vmem>>, vector<1x32xf32>
    %cst_62 = arith.constant dense<0.000000e+00> : vector<16xf32>
    %218 = vector.multi_reduction <add>, %177, %cst_62 [1] : vector<16x32xf32> to vector<16xf32>
    %219 = vector.shape_cast %218 : vector<16xf32> to vector<16x1xf32>
    %cst_63 = arith.constant 3.200000e+01 : f32
    %220 = vector.broadcast %cst_63 : f32 to vector<16x1xf32>
    %221 = arith.divf %219, %220 : vector<16x1xf32>
    %222 = vector.broadcast %221 : vector<16x1xf32> to vector<16x32xf32>
    %223 = arith.subf %177, %222 : vector<16x32xf32>
    %224 = arith.mulf %223, %223 : vector<16x32xf32>
    %cst_64 = arith.constant dense<0.000000e+00> : vector<16xf32>
    %225 = vector.multi_reduction <add>, %224, %cst_64 [1] : vector<16x32xf32> to vector<16xf32>
    %226 = vector.shape_cast %225 : vector<16xf32> to vector<16x1xf32>
    %cst_65 = arith.constant 0.0322580636 : f32
    %227 = vector.broadcast %cst_65 : f32 to vector<16x1xf32>
    %228 = arith.mulf %226, %227 : vector<16x1xf32>
    %229 = math.sqrt %228 : vector<16x1xf32>
    %cst_66 = arith.constant 9.99999997E-7 : f32
    %230 = vector.broadcast %cst_66 : f32 to vector<16x1xf32>
    %231 = arith.addf %229, %230 : vector<16x1xf32>
    %232 = tpu.reciprocal %231 {approx = true} : vector<16x1xf32> -> vector<16x1xf32>
    %233 = vector.broadcast %221 : vector<16x1xf32> to vector<16x32xf32>
    %234 = arith.subf %177, %233 : vector<16x32xf32>
    %235 = vector.broadcast %216 : vector<1x32xf32> to vector<16x32xf32>
    %236 = arith.mulf %235, %234 : vector<16x32xf32>
    %237 = vector.broadcast %232 : vector<16x1xf32> to vector<16x32xf32>
    %238 = arith.mulf %236, %237 : vector<16x32xf32>
    %239 = vector.broadcast %217 : vector<1x32xf32> to vector<16x32xf32>
    %240 = arith.addf %238, %239 : vector<16x32xf32>
    %c0_67 = arith.constant 0 : index
    %c128_68 = arith.constant 128 : index
    %241 = vector.load %arg2[%c0_67, %c128_68] : memref<64x640xf32, #tpu.memory_space<vmem>>, vector<32x96xf32>
    %cst_69 = arith.constant dense<0.000000e+00> : vector<16x96xf32>
    %242 = tpu.matmul %240, %241, %cst_69 {dimension_numbers = #tpu.dot_dimension_numbers<[1], [0], [0], [1], [0, 0, 1, 1], [], []>} : vector<16x32xf32>, vector<32x96xf32>, vector<16x96xf32> -> vector<16x96xf32>
    %243 = vector.extract_strided_slice %242 {offsets = [0, 0], sizes = [16, 8], strides = [1, 1]} : vector<16x96xf32> to vector<16x8xf32>
    %244 = vector.shape_cast %243 : vector<16x8xf32> to vector<2x8x8xf32>
    %245 = vector.extract_strided_slice %242 {offsets = [0, 8], sizes = [16, 8], strides = [1, 1]} : vector<16x96xf32> to vector<16x8xf32>
    %246 = vector.shape_cast %245 : vector<16x8xf32> to vector<2x8x8xf32>
    %247 = vector.extract_strided_slice %242 {offsets = [0, 16], sizes = [16, 8], strides = [1, 1]} : vector<16x96xf32> to vector<16x8xf32>
    %248 = vector.shape_cast %247 : vector<16x8xf32> to vector<2x8x8xf32>
    %249 = vector.extract_strided_slice %242 {offsets = [0, 24], sizes = [16, 8], strides = [1, 1]} : vector<16x96xf32> to vector<16x8xf32>
    %250 = vector.shape_cast %249 : vector<16x8xf32> to vector<2x8x8xf32>
    %251 = tpu.concatenate %244, %246, %248, %250 in 0 : vector<2x8x8xf32>, vector<2x8x8xf32>, vector<2x8x8xf32>, vector<2x8x8xf32> -> vector<8x8x8xf32>
    %252 = vector.extract_strided_slice %242 {offsets = [0, 32], sizes = [16, 8], strides = [1, 1]} : vector<16x96xf32> to vector<16x8xf32>
    %253 = vector.shape_cast %252 : vector<16x8xf32> to vector<2x8x8xf32>
    %254 = vector.extract_strided_slice %242 {offsets = [0, 40], sizes = [16, 8], strides = [1, 1]} : vector<16x96xf32> to vector<16x8xf32>
    %255 = vector.shape_cast %254 : vector<16x8xf32> to vector<2x8x8xf32>
    %256 = vector.extract_strided_slice %242 {offsets = [0, 48], sizes = [16, 8], strides = [1, 1]} : vector<16x96xf32> to vector<16x8xf32>
    %257 = vector.shape_cast %256 : vector<16x8xf32> to vector<2x8x8xf32>
    %258 = vector.extract_strided_slice %242 {offsets = [0, 56], sizes = [16, 8], strides = [1, 1]} : vector<16x96xf32> to vector<16x8xf32>
    %259 = vector.shape_cast %258 : vector<16x8xf32> to vector<2x8x8xf32>
    %260 = tpu.concatenate %253, %255, %257, %259 in 0 : vector<2x8x8xf32>, vector<2x8x8xf32>, vector<2x8x8xf32>, vector<2x8x8xf32> -> vector<8x8x8xf32>
    %261 = vector.extract_strided_slice %242 {offsets = [0, 64], sizes = [16, 8], strides = [1, 1]} : vector<16x96xf32> to vector<16x8xf32>
    %262 = vector.shape_cast %261 : vector<16x8xf32> to vector<2x8x8xf32>
    %263 = vector.extract_strided_slice %242 {offsets = [0, 72], sizes = [16, 8], strides = [1, 1]} : vector<16x96xf32> to vector<16x8xf32>
    %264 = vector.shape_cast %263 : vector<16x8xf32> to vector<2x8x8xf32>
    %265 = vector.extract_strided_slice %242 {offsets = [0, 80], sizes = [16, 8], strides = [1, 1]} : vector<16x96xf32> to vector<16x8xf32>
    %266 = vector.shape_cast %265 : vector<16x8xf32> to vector<2x8x8xf32>
    %267 = vector.extract_strided_slice %242 {offsets = [0, 88], sizes = [16, 8], strides = [1, 1]} : vector<16x96xf32> to vector<16x8xf32>
    %268 = vector.shape_cast %267 : vector<16x8xf32> to vector<2x8x8xf32>
    %269 = tpu.concatenate %262, %264, %266, %268 in 0 : vector<2x8x8xf32>, vector<2x8x8xf32>, vector<2x8x8xf32>, vector<2x8x8xf32> -> vector<8x8x8xf32>
    "tpu.trace_start"() <{level = 10 : i32, message = "nqd,nkd->nqk"}> : () -> ()
    %cst_70 = arith.constant dense<0.000000e+00> : vector<8x8x8xf32>
    %270 = tpu.matmul %251, %260, %cst_70 {dimension_numbers = #tpu.dot_dimension_numbers<[2], [2], [1], [1], [0, 0, 0, 1, 1, 1], [0], [0]>} : vector<8x8x8xf32>, vector<8x8x8xf32>, vector<8x8x8xf32> -> vector<8x8x8xf32>
    "tpu.trace_stop"() : () -> ()
    %cst_71 = arith.constant dense<0xFF800000> : vector<8x8xf32>
    %271 = vector.multi_reduction <maximumf>, %270, %cst_71 [2] : vector<8x8x8xf32> to vector<8x8xf32>
    %272 = vector.shape_cast %271 : vector<8x8xf32> to vector<8x8x1xf32>
    %273 = vector.broadcast %272 : vector<8x8x1xf32> to vector<8x8x8xf32>
    %274 = arith.subf %270, %273 : vector<8x8x8xf32>
    %275 = math.exp %274 : vector<8x8x8xf32>
    %cst_72 = arith.constant dense<0.000000e+00> : vector<8x8xf32>
    %276 = vector.multi_reduction <add>, %275, %cst_72 [2] : vector<8x8x8xf32> to vector<8x8xf32>
    %277 = vector.shape_cast %276 : vector<8x8xf32> to vector<8x8x1xf32>
    %278 = tpu.reciprocal %277 {approx = true} : vector<8x8x1xf32> -> vector<8x8x1xf32>
    %279 = vector.broadcast %278 : vector<8x8x1xf32> to vector<8x8x8xf32>
    %280 = arith.mulf %275, %279 : vector<8x8x8xf32>
    "tpu.trace_start"() <{level = 10 : i32, message = "nqk,nkd->nqd"}> : () -> ()
    %cst_73 = arith.constant dense<0.000000e+00> : vector<8x8x8xf32>
    %281 = tpu.matmul %280, %269, %cst_73 {dimension_numbers = #tpu.dot_dimension_numbers<[2], [1], [1], [2], [0, 0, 0, 1, 1, 2], [0], [0]>} : vector<8x8x8xf32>, vector<8x8x8xf32>, vector<8x8x8xf32> -> vector<8x8x8xf32>
    "tpu.trace_stop"() : () -> ()
    %282 = vector.extract_strided_slice %281 {offsets = [0, 0, 0], sizes = [2, 8, 8], strides = [1, 1, 1]} : vector<8x8x8xf32> to vector<2x8x8xf32>
    %283 = vector.shape_cast %282 : vector<2x8x8xf32> to vector<16x8xf32>
    %284 = vector.extract_strided_slice %281 {offsets = [2, 0, 0], sizes = [2, 8, 8], strides = [1, 1, 1]} : vector<8x8x8xf32> to vector<2x8x8xf32>
    %285 = vector.shape_cast %284 : vector<2x8x8xf32> to vector<16x8xf32>
    %286 = vector.extract_strided_slice %281 {offsets = [4, 0, 0], sizes = [2, 8, 8], strides = [1, 1, 1]} : vector<8x8x8xf32> to vector<2x8x8xf32>
    %287 = vector.shape_cast %286 : vector<2x8x8xf32> to vector<16x8xf32>
    %288 = vector.extract_strided_slice %281 {offsets = [6, 0, 0], sizes = [2, 8, 8], strides = [1, 1, 1]} : vector<8x8x8xf32> to vector<2x8x8xf32>
    %289 = vector.shape_cast %288 : vector<2x8x8xf32> to vector<16x8xf32>
    %290 = tpu.concatenate %283, %285, %287, %289 in 1 : vector<16x8xf32>, vector<16x8xf32>, vector<16x8xf32>, vector<16x8xf32> -> vector<16x32xf32>
    %c0_74 = arith.constant 0 : index
    %c256_75 = arith.constant 256 : index
    %291 = vector.load %arg2[%c0_74, %c256_75] : memref<64x640xf32, #tpu.memory_space<vmem>>, vector<32x32xf32>
    %cst_76 = arith.constant dense<0.000000e+00> : vector<16x32xf32>
    %292 = tpu.matmul %290, %291, %cst_76 {dimension_numbers = #tpu.dot_dimension_numbers<[1], [0], [0], [1], [0, 0, 1, 1], [], []>} : vector<16x32xf32>, vector<32x32xf32>, vector<16x32xf32> -> vector<16x32xf32>
    %293 = arith.addf %177, %292 : vector<16x32xf32>
    %c2_77 = arith.constant 2 : index
    %c0_78 = arith.constant 0 : index
    %294 = vector.load %arg3[%c2_77, %c0_78] : memref<16x128xf32, #tpu.memory_space<vmem>>, vector<1x32xf32>
    %c3_79 = arith.constant 3 : index
    %c0_80 = arith.constant 0 : index
    %295 = vector.load %arg3[%c3_79, %c0_80] : memref<16x128xf32, #tpu.memory_space<vmem>>, vector<1x32xf32>
    %cst_81 = arith.constant dense<0.000000e+00> : vector<16xf32>
    %296 = vector.multi_reduction <add>, %293, %cst_81 [1] : vector<16x32xf32> to vector<16xf32>
    %297 = vector.shape_cast %296 : vector<16xf32> to vector<16x1xf32>
    %cst_82 = arith.constant 3.200000e+01 : f32
    %298 = vector.broadcast %cst_82 : f32 to vector<16x1xf32>
    %299 = arith.divf %297, %298 : vector<16x1xf32>
    %300 = vector.broadcast %299 : vector<16x1xf32> to vector<16x32xf32>
    %301 = arith.subf %293, %300 : vector<16x32xf32>
    %302 = arith.mulf %301, %301 : vector<16x32xf32>
    %cst_83 = arith.constant dense<0.000000e+00> : vector<16xf32>
    %303 = vector.multi_reduction <add>, %302, %cst_83 [1] : vector<16x32xf32> to vector<16xf32>
    %304 = vector.shape_cast %303 : vector<16xf32> to vector<16x1xf32>
    %cst_84 = arith.constant 0.0322580636 : f32
    %305 = vector.broadcast %cst_84 : f32 to vector<16x1xf32>
    %306 = arith.mulf %304, %305 : vector<16x1xf32>
    %307 = math.sqrt %306 : vector<16x1xf32>
    %cst_85 = arith.constant 9.99999997E-7 : f32
    %308 = vector.broadcast %cst_85 : f32 to vector<16x1xf32>
    %309 = arith.addf %307, %308 : vector<16x1xf32>
    %310 = tpu.reciprocal %309 {approx = true} : vector<16x1xf32> -> vector<16x1xf32>
    %311 = vector.broadcast %299 : vector<16x1xf32> to vector<16x32xf32>
    %312 = arith.subf %293, %311 : vector<16x32xf32>
    %313 = vector.broadcast %294 : vector<1x32xf32> to vector<16x32xf32>
    %314 = arith.mulf %313, %312 : vector<16x32xf32>
    %315 = vector.broadcast %310 : vector<16x1xf32> to vector<16x32xf32>
    %316 = arith.mulf %314, %315 : vector<16x32xf32>
    %317 = vector.broadcast %295 : vector<1x32xf32> to vector<16x32xf32>
    %318 = arith.addf %316, %317 : vector<16x32xf32>
    %c0_86 = arith.constant 0 : index
    %c384_87 = arith.constant 384 : index
    %319 = vector.load %arg2[%c0_86, %c384_87] : memref<64x640xf32, #tpu.memory_space<vmem>>, vector<32x64xf32>
    %cst_88 = arith.constant dense<0.000000e+00> : vector<16x64xf32>
    %320 = tpu.matmul %318, %319, %cst_88 {dimension_numbers = #tpu.dot_dimension_numbers<[1], [0], [0], [1], [0, 0, 1, 1], [], []>} : vector<16x32xf32>, vector<32x64xf32>, vector<16x64xf32> -> vector<16x64xf32>
    %c8_89 = arith.constant 8 : index
    %c0_90 = arith.constant 0 : index
    %321 = vector.load %arg3[%c8_89, %c0_90] : memref<16x128xf32, #tpu.memory_space<vmem>>, vector<1x64xf32>
    %322 = vector.broadcast %321 : vector<1x64xf32> to vector<16x64xf32>
    %323 = arith.addf %320, %322 : vector<16x64xf32>
    %cst_91 = arith.constant 0.000000e+00 : f32
    %324 = vector.broadcast %cst_91 : f32 to vector<16x64xf32>
    %325 = arith.maximumf %323, %324 : vector<16x64xf32>
    %c0_92 = arith.constant 0 : index
    %c512_93 = arith.constant 512 : index
    %326 = vector.load %arg2[%c0_92, %c512_93] : memref<64x640xf32, #tpu.memory_space<vmem>>, vector<64x32xf32>
    %cst_94 = arith.constant dense<0.000000e+00> : vector<16x32xf32>
    %327 = tpu.matmul %325, %326, %cst_94 {dimension_numbers = #tpu.dot_dimension_numbers<[1], [0], [0], [1], [0, 0, 1, 1], [], []>} : vector<16x64xf32>, vector<64x32xf32>, vector<16x32xf32> -> vector<16x32xf32>
    %328 = arith.addf %293, %327 : vector<16x32xf32>
    %c6_95 = arith.constant 6 : index
    %c0_96 = arith.constant 0 : index
    %329 = vector.load %arg3[%c6_95, %c0_96] : memref<16x128xf32, #tpu.memory_space<vmem>>, vector<1x32xf32>
    %330 = vector.broadcast %329 : vector<1x32xf32> to vector<16x32xf32>
    %331 = arith.addf %328, %330 : vector<16x32xf32>
    %332 = vector.broadcast %215 : vector<16x1xf32> to vector<16x32xf32>
    %333 = arith.mulf %331, %332 : vector<16x32xf32>
    %cst_97 = arith.constant 1.000000e+00 : f32
    %334 = vector.broadcast %cst_97 : f32 to vector<16x1xf32>
    %335 = arith.subf %334, %215 : vector<16x1xf32>
    %336 = vector.broadcast %335 : vector<16x1xf32> to vector<16x32xf32>
    %337 = arith.mulf %174, %336 : vector<16x32xf32>
    %338 = arith.addf %333, %337 : vector<16x32xf32>
    %c4 = arith.constant 4 : index
    %c0_98 = arith.constant 0 : index
    %339 = vector.load %arg3[%c4, %c0_98] : memref<16x128xf32, #tpu.memory_space<vmem>>, vector<1x32xf32>
    %c5 = arith.constant 5 : index
    %c0_99 = arith.constant 0 : index
    %340 = vector.load %arg3[%c5, %c0_99] : memref<16x128xf32, #tpu.memory_space<vmem>>, vector<1x32xf32>
    %cst_100 = arith.constant dense<0.000000e+00> : vector<16xf32>
    %341 = vector.multi_reduction <add>, %338, %cst_100 [1] : vector<16x32xf32> to vector<16xf32>
    %342 = vector.shape_cast %341 : vector<16xf32> to vector<16x1xf32>
    %cst_101 = arith.constant 3.200000e+01 : f32
    %343 = vector.broadcast %cst_101 : f32 to vector<16x1xf32>
    %344 = arith.divf %342, %343 : vector<16x1xf32>
    %345 = vector.broadcast %344 : vector<16x1xf32> to vector<16x32xf32>
    %346 = arith.subf %338, %345 : vector<16x32xf32>
    %347 = arith.mulf %346, %346 : vector<16x32xf32>
    %cst_102 = arith.constant dense<0.000000e+00> : vector<16xf32>
    %348 = vector.multi_reduction <add>, %347, %cst_102 [1] : vector<16x32xf32> to vector<16xf32>
    %349 = vector.shape_cast %348 : vector<16xf32> to vector<16x1xf32>
    %cst_103 = arith.constant 0.0322580636 : f32
    %350 = vector.broadcast %cst_103 : f32 to vector<16x1xf32>
    %351 = arith.mulf %349, %350 : vector<16x1xf32>
    %352 = math.sqrt %351 : vector<16x1xf32>
    %cst_104 = arith.constant 9.99999997E-7 : f32
    %353 = vector.broadcast %cst_104 : f32 to vector<16x1xf32>
    %354 = arith.addf %352, %353 : vector<16x1xf32>
    %355 = tpu.reciprocal %354 : vector<16x1xf32> -> vector<16x1xf32>
    %356 = vector.broadcast %344 : vector<16x1xf32> to vector<16x32xf32>
    %357 = arith.subf %338, %356 : vector<16x32xf32>
    %358 = vector.broadcast %339 : vector<1x32xf32> to vector<16x32xf32>
    %359 = arith.mulf %358, %357 : vector<16x32xf32>
    %360 = vector.broadcast %355 : vector<16x1xf32> to vector<16x32xf32>
    %361 = arith.mulf %359, %360 : vector<16x32xf32>
    %362 = vector.broadcast %340 : vector<1x32xf32> to vector<16x32xf32>
    %363 = arith.addf %361, %362 : vector<16x32xf32>
    %364 = tpu.concatenate %363, %210, %212 in 1 : vector<16x32xf32>, vector<16x1xf32>, vector<16x1xf32> -> vector<16x34xf32>
    %c0_105 = arith.constant 0 : index
    %c0_106 = arith.constant 0 : index
    %365 = vector.load %arg4[%c0_105, %c0_106] : memref<16x34xf32, #tpu.memory_space<vmem>>, vector<16x34xf32>
    tpu.vector_store %arg4[%c0_105, %c0_106], %364 {strides = array<i32>} : memref<16x34xf32, #tpu.memory_space<vmem>>, vector<16x34xf32>,
    return
  }
}

</mosaic_0001>

<bundles_post_ra>
// kernel: squeeze.4
= control target key start
LH: loop header
LB: loop body
LE: loop exit
PB: predicated region body
PF: predicated region fallthrough
CT: control target
= control target key end

     0   :  { %s85_s0 = inlined_call_operand.vmem [shape: f32[16], index: 0, kind: input, shape index: {}]   ;;  %s86_s1 = inlined_call_operand.hbm [shape: f32[2,8], index: 1, kind: output, shape index: {}]  }
   0x1   :  { %v5_v0 = vld [vmem:[%s85_s0] sm:$0x1] }
   0x2   :  { %2 = vsyncpa [#allocation1], 0  ;;  %6 = vst [vmem:[#allocation3] sm:$0x1] %v5_v0  ;;  %vm8_vm0 = vcmask 64512   ;;  %s58_s0 = smov 120  }
   0x3   :  { %s59_s8 = smov [#allocation0]  }
   0x4   :  { %s26_s9 = sshll.u32 %s59_s8, 4  ;;  %s27_s9 = int_to_ptr.vmem [resolvable:$true] %s26_s9 }
   0x5   :  { %s34_s10 = scalar_lea.vmem %s27_s9, 32  ;;  %p39_p1 = scmp.lt.s32.totalorder %s27_s9, %s27_s9 }
   0x6   :  { %p35_p0 = scmp.ne.s32.totalorder %s27_s9, %s34_s10  ;;  %p40_p2 = scmp.lt.s32.totalorder %s34_s10, %s34_s10 }
   0x8   :  { %p41_p3 = por %p40_p2, %p39_p1 }
   0x9   :  { %v10_v1 = vld [vmem:[#allocation3] sm:$0x1]  }
   0xa   :  { %v7_v2 = vld [vmem:[#allocation3] sm:$0x1]   ;;  %11 = vrot.lane.b32.xlu0 %v10_v1, %s58_s0  ;;  %p42_p4 = pnand %p41_p3, %p35_p0 }
   0xb   :  { %9 = vst.msk [vmem:[#allocation2] sm:$0x1] %vm8_vm0, %v7_v2  }
  0x7c   :  { %v12_v3 = vpop.permute.xlu0 %11  }
  0x7d   :  { %15 = vst.msk [vmem:[#allocation2 + $0x1] sm:$0x1] %vm8_vm0, %v12_v3  }
  0x84   :  { %v19_v4 = vld [vmem:[#allocation2] sm:$0x3] }
  0x85   :  { %21 = vst [vmem:[#allocation0] sm:$0x3] %v19_v4 }
  0x86   :  { %45 = shalt.err (!%p42_p4)
}
  0x87   :  { %s46_s13 = scalar_lea.hbm %s86_s1, 32 }
  0x88   :  { %p47_p5 = scmp.ne.s32.totalorder %s86_s1, %s46_s13  ;;  %p50_p6 = scmp.lt.u32.totalorder %s46_s13, %s86_s1 }
  0x8a   :  { %p52_p7 = pnand %p50_p6, %p47_p5 }
  0x8c   :  { %55 = shalt.err (!%p52_p7)
}
  0x8d   :  { %29 = dma.vmem_to_hbm [thread:$0]  %s27_s9, 32, %s86_s1, [#allocation1]  }
  0x8e   :  { %56 = dma.done.wait [#allocation1], 32  }
  0x8f   :  { %57 = vsyncadd [#allocation1], 4294967264 }
  0x90   :  { %31 = vsyncpa [#allocation1], 1 }

// kernel: encoder_forward.1
= control target key start
LH: loop header
LB: loop body
LE: loop exit
PB: predicated region body
PF: predicated region fallthrough
CT: control target
= control target key end

     0   :  { %vm27_vm0 = vcmask 261120   ;;  %v4754_v58 = vmov 0.0   ;;  %vm4755_vm5 = vmmov 0   ;;  %s4756_s16 = smov 120   ;;  %s4757_s17 = smov 112   ;;  %vm338_vm6 = vcmask 64512   ;;  %s5533_s2 = inlined_call_operand.vmem [shape: f32[64,640], index: 2, kind: input, shape index: {}]   ;;  %s5534_s0 = inlined_call_operand.vmem [shape: f32[16,32], index: 0, kind: input, shape index: {}]   ;;  %s5535_s1 = inlined_call_operand.vmem [shape: f32[2,16,32], index: 1, kind: input, shape index: {}]   ;;  %s5536_s3 = inlined_call_operand.vmem [shape: f32[16,128], index: 3, kind: input, shape index: {}]   ;;  %s5537_s4 = inlined_call_operand.vmem [shape: f32[16,34], index: 4, kind: output, shape index: {}]  }
   0x1   :  { %v21_v0 = vld [vmem:[%s5533_s2] sm:$0xff]  ;;  %v22_v1 = vld [vmem:[%s5533_s2 + $0x28] sm:$0xff]  ;;  %v23_v2 = vld [vmem:[%s5533_s2 + $0x50] sm:$0xff]  ;;  %4278 = vmatprep.subr.mxu0 %v4754_v58  ;;  %4280 = vmatprep.mubr.msk.f32.mxu0 %vm4755_vm5, %v4754_v58  ;;  %s4758_s18 = smov 104   ;;  %s4759_s19 = smov 96   ;;  %vm1667_vm7 = vcmask 130048  }
   0x2   :  { %v4531_v3 = vpack.c.bf16 %v22_v1, %v21_v0  ;;  %v24_v4 = vld [vmem:[%s5533_s2 + $0x78] sm:$0xff]  ;;  %v19_v5 = vld [vmem:[%s5534_s0] sm:$0xff]  ;;  %v20_v7 = vld [vmem:[%s5534_s0 + $0x8] sm:$0xff]  ;;  %s4760_s20 = smov 64   ;;  %s4761_s29 = smov 8   ;;  %vm1670_vm8 = vcmask 195584  }
   0x3   :  { %v4535_v6 = vpack.c.bf16 %v24_v4, %v23_v2  ;;  %4264 = vmatprep.mubr.msk.f32.mxu1 %vm27_vm0, %v19_v5  ;;  %v25_v8 = vld [vmem:[%s5535_s1] sm:$0xff]  ;;  %v26_v10 = vld [vmem:[%s5535_s1 + $0x8] sm:$0xff]  ;;  %v238_v27 = vld [vmem:[%s5533_s2 + $0x30] sm:$0xff]  ;;  %s4762_s30 = smov 16   ;;  %s4763_s0 = smov 24   ;;  %vm1914_vm13 = vcmask 523264  }
   0x4   :  { %4532 = vmatprep.subr.bf16.mxu1 %v4531_v3  ;;  %v237_v26 = vld [vmem:[%s5533_s2 + $0x8] sm:$0xff]  ;;  %v239_v28 = vld [vmem:[%s5533_s2 + $0x58] sm:$0xff]  ;;  %v240_v30 = vld [vmem:[%s5533_s2 + $0x80] sm:$0xff]  ;;  %s4765_s22 = smov 32   ;;  %s4766_s23 = smov 33  }
   0x5   :  { %4534 = vmatpush3.bf16.msra.mxu1 %v4531_v3  ;;  %v4839_v29 = vpack.c.bf16 %v238_v27, %v237_v26  ;;  %v4844_v31 = vpack.c.bf16 %v240_v30, %v239_v28  ;;  %v4853_v48 = vld [vmem:[%s5536_s3] ss:$0 sm:$0xff]  ;;  %v4859_v51 = vld [vmem:[%s5536_s3 + $0x1] ss:$0 sm:$0xff] }
   0x6   :  { %4536 = vmatprep.subr.bf16.mxu1 %v4535_v6 }
   0x9   :  { %4538 = vmatpush3.bf16.msra.mxu1 %v4535_v6 }
   0xa   :  { %4540 = vmatprep.subr.bf16.mxu1 %v4839_v29 }
   0xc   :  { %4265 = vmatmul.mubr.msk.f32.vlgmr.msra.gmra.mrb[0].mxu1 %vm27_vm0, %v20_v7 }
   0xd   :  { %4542 = vmatpush3.bf16.msra.mxu1 %v4839_v29 }
   0xe   :  { %4544 = vmatprep.subr.bf16.mxu1 %v4844_v31 }
  0x11   :  { %4546 = vmatpush3.bf16.msra.mxu1 %v4844_v31 }
  0x12   :  { %4283 = vmatprep.subr.mxu1 %v4754_v58 }
  0xdf   :  { %v4266_v9 = vpop.f32.mrb[0].mxu1 }
  0xe0   :  { %v100_v11 = vpop.f32.mrb[1].mxu1  ;;  %v4820_v13 = vadd.f32 %v4266_v9, %v26_v10 }
  0xe1   :  { %v4818_v12 = vadd.f32 %v100_v11, %v25_v8 }
  0xe2   :  { %v187_v15 = vsel %vm27_vm0, %v4820_v13, 0.0 }
  0xe3   :  { %v184_v14 = vsel %vm27_vm0, %v4818_v12, 0.0 }
  0xe4   :  { %185 = vadd.xlane.f32.xlu0 %v184_v14 }
  0xe8   :  { %188 = vadd.xlane.f32.xlu0 %v187_v15 }
 0x171   :  { %v186_v16 = vpop.xlane.xlu0 %185 }
 0x172   :  { %v191_v17 = vmul.f32 0.03125, %v186_v16 }
 0x174   :  { %v193_v18 = vsub.f32 %v4818_v12, %v191_v17 }
 0x175   :  { %v189_v19 = vpop.xlane.xlu0 %188 }
 0x176   :  { %v192_v20 = vmul.f32 0.03125, %v189_v19  ;;  %v195_v21 = vmul.f32 %v193_v18, %v193_v18  ;;  %v227_v49 = vmul.f32 %v4853_v48, %v193_v18 }
 0x178   :  { %v194_v22 = vsub.f32 %v4820_v13, %v192_v20  ;;  %v197_v23 = vsel %vm27_vm0, %v195_v21, 0.0 }
 0x179   :  { %198 = vadd.xlane.f32.xlu1 %v197_v23 }
 0x17a   :  { %v196_v24 = vmul.f32 %v194_v22, %v194_v22  ;;  %v228_v53 = vmul.f32 %v4853_v48, %v194_v22 }
 0x17c   :  { %v200_v25 = vsel %vm27_vm0, %v196_v24, 0.0 }
 0x17d   :  { %201 = vadd.xlane.f32.xlu1 %v200_v25 }
 0x206   :  { %v199_v32 = vpop.xlane.xlu1 %198 }
 0x207   :  { %v203_v33 = vmul.f32 0.032258064, %v199_v32 }
 0x209   :  { %4634 = vrsqrt.f32 %v203_v33  ;;  %vm207_vm1 = vcmp.eq.f32.partialorder %v203_v33, inf  ;;  %v210_v38 = vand.u32 2147483648, %v203_v33  ;;  %vm209_vm2 = vcmp.eq.f32.partialorder %v203_v33, 0.0 }
 0x20a   :  { %v202_v34 = vpop.xlane.xlu1 %201 }
 0x20b   :  { %v204_v35 = vmul.f32 0.032258064, %v202_v34 }
 0x20d   :  { %4636 = vrsqrt.f32 %v204_v35  ;;  %vm214_vm3 = vcmp.eq.f32.partialorder %v204_v35, inf  ;;  %v217_v44 = vand.u32 2147483648, %v204_v35  ;;  %vm216_vm4 = vcmp.eq.f32.partialorder %v204_v35, 0.0 }
 0x213   :  { %v4635_v36 = vpop.eup %4634 }
 0x214   :  { %v206_v37 = vmul.f32 %v4635_v36, %v203_v33 }
 0x216   :  { %v208_v39 = vsel %vm207_vm1, %v203_v33, %v206_v37 }
 0x217   :  { %v4637_v40 = vpop.eup %4636  ;;  %v211_v41 = vsel %vm209_vm2, %v210_v38, %v208_v39 }
 0x218   :  { %v213_v42 = vmul.f32 %v4637_v40, %v204_v35  ;;  %v219_v43 = vadd.f32 1e-06, %v211_v41 }
 0x21a   :  { %v215_v45 = vsel %vm214_vm3, %v204_v35, %v213_v42  ;;  %4638 = vrcp.f32 %v219_v43 }
 0x21b   :  { %v218_v46 = vsel %vm216_vm4, %v217_v44, %v215_v45 }
 0x21c   :  { %v220_v47 = vadd.f32 1e-06, %v218_v46 }
 0x21e   :  { %4640 = vrcp.f32 %v220_v47 }
 0x224   :  { %v4639_v50 = vpop.eup %4638 }
 0x225   :  { %v229_v52 = vmul.f32 %v4639_v50, %v227_v49 }
 0x227   :  { %v235_v54 = vadd.f32 %v4859_v51, %v229_v52 }
 0x228   :  { %v4641_v55 = vpop.eup %4640 }
 0x229   :  { %v230_v56 = vmul.f32 %v4641_v55, %v228_v53  ;;  %4275 = vmatprep.mubr.msk.f32.mxu1 %vm27_vm0, %v235_v54 }
 0x22b   :  { %v236_v57 = vadd.f32 %v4859_v51, %v230_v56 }
 0x22d   :  { %4276 = vmatmul.mubr.msk.f32.vlgmr.msra.gmra.mrb[2].mxu1 %vm27_vm0, %v236_v57 }
 0x22e   :  { %4285 = vmatprep.mubr.msk.f32.mxu1 %vm4755_vm5, %v4754_v58 }
 0x300   :  { %v4872_v59 = vpop.f32.mrb[2].mxu1 }
 0x301   :  { %326 = vrot.lane.b32.xlu1 %v4872_v59, %s4756_s16  ;;  %v4876_v60 = vpop.f32.mrb[3].mxu1 }
 0x302   :  { %324 = vrot.lane.b32.xlu0 %v4876_v60, %s4756_s16 }
 0x305   :  { %328 = vrot.lane.b32.xlu1 %v4876_v60, %s4757_s17 }
 0x306   :  { %332 = vrot.lane.b32.xlu0 %v4876_v60, %s4758_s18 }
 0x309   :  { %330 = vrot.lane.b32.xlu1 %v4872_v59, %s4757_s17 }
 0x30a   :  { %336 = vrot.lane.b32.xlu0 %v4876_v60, %s4759_s19 }
 0x30d   :  { %334 = vrot.lane.b32.xlu1 %v4872_v59, %s4758_s18 }
 0x311   :  { %413 = vrot.lane.b32.xlu1 %v4872_v59, %s4759_s19 }
 0x373   :  { %v4892_v61 = vpop.permute.xlu1 %326 }
 0x374   :  { %565 = vrot.lane.b32.xlu1 %v4892_v61, %s4759_s19  ;;  %v4896_v62 = vpop.permute.xlu0 %324 }
 0x375   :  { %489 = vrot.lane.b32.xlu0 %v4896_v62, %s4759_s19 }
 0x377   :  { %v4900_v63 = vpop.permute.xlu1 %328 }
 0x378   :  { %v4902_v0 = vpop.permute.xlu0 %332 }
 0x379   :  { %641 = vrot.lane.b32.xlu0 %v4900_v63, %s4759_s19 }
 0x37b   :  { %v4906_v1 = vpop.permute.xlu1 %330 }
 0x37c   :  { %717 = vrot.lane.b32.xlu1 %v4906_v1, %s4759_s19  ;;  %v337_v2 = vpop.permute.xlu0 %336 }
 0x37d   :  { %793 = vrot.lane.b32.xlu0 %v4902_v0, %s4759_s19  ;;  %4279 = vmatpush3.xpose.msk.msra.mxu0 %vm338_vm6, %v337_v2 }
 0x37e   :  { %4288 = vmatprep.subr.mxu0 %v4754_v58 }
 0x37f   :  { %v4914_v3 = vpop.permute.xlu1 %334 }
 0x380   :  { %869 = vrot.lane.b32.xlu1 %v4914_v3, %s4759_s19  ;;  %4281 = vmatmul.mubr.msk.f32.vlgmr.msra.gmra.mrb[0].mxu0 %vm338_vm6, %v4876_v60 }
 0x381   :  { %4290 = vmatprep.mubr.msk.f32.mxu0 %vm4755_vm5, %v4754_v58 }
 0x383   :  { %v414_v4 = vpop.permute.xlu1 %413 }
 0x384   :  { %4284 = vmatpush3.xpose.msk.msra.mxu1 %vm338_vm6, %v414_v4 }
 0x385   :  { %4293 = vmatprep.subr.mxu1 %v4754_v58 }
 0x387   :  { %4286 = vmatmul.mubr.msk.f32.vlgmr.msra.gmra.mrb[4].mxu1 %vm338_vm6, %v4872_v59 }
 0x388   :  { %4295 = vmatprep.mubr.msk.f32.mxu1 %vm4755_vm5, %v4754_v58 }
 0x3e6   :  { %v566_v5 = vpop.permute.xlu1 %565 }
 0x3e7   :  { %4294 = vmatpush3.xpose.msk.msra.mxu1 %vm338_vm6, %v566_v5  ;;  %v490_v6 = vpop.permute.xlu0 %489 }
 0x3e8   :  { %4289 = vmatpush3.xpose.msk.msra.mxu0 %vm338_vm6, %v490_v6  ;;  %4303 = vmatprep.subr.mxu1 %v4754_v58 }
 0x3e9   :  { %4298 = vmatprep.subr.mxu0 %v4754_v58 }
 0x3ea   :  { %4296 = vmatmul.mubr.msk.f32.vlgmr.msra.gmra.mrb[6].mxu1 %vm338_vm6, %v4892_v61 }
 0x3eb   :  { %4291 = vmatmul.mubr.msk.f32.vlgmr.msra.gmra.mrb[2].mxu0 %vm338_vm6, %v4896_v62  ;;  %v642_v7 = vpop.permute.xlu0 %641  ;;  %4305 = vmatprep.mubr.msk.f32.mxu1 %vm4755_vm5, %v4754_v58 }
 0x3ec   :  { %4299 = vmatpush3.xpose.msk.msra.mxu0 %vm338_vm6, %v642_v7  ;;  %4300 = vmatprep.mubr.msk.f32.mxu0 %vm4755_vm5, %v4754_v58 }
 0x3ed   :  { %4308 = vmatprep.subr.mxu0 %v4754_v58 }
 0x3ee   :  { %v718_v8 = vpop.permute.xlu1 %717 }
 0x3ef   :  { %4301 = vmatmul.mubr.msk.f32.vlgmr.msra.gmra.mrb[4].mxu0 %vm338_vm6, %v4900_v63  ;;  %4304 = vmatpush3.xpose.msk.msra.mxu1 %vm338_vm6, %v718_v8  ;;  %v794_v9 = vpop.permute.xlu0 %793 }
 0x3f0   :  { %4309 = vmatpush3.xpose.msk.msra.mxu0 %vm338_vm6, %v794_v9  ;;  %4313 = vmatprep.subr.mxu1 %v4754_v58 }
 0x3f1   :  { %4310 = vmatprep.mubr.msk.f32.mxu0 %vm4755_vm5, %v4754_v58  ;;  %4318 = vmatprep.subr.mxu0 %v4754_v58 }
 0x3f2   :  { %4306 = vmatmul.mubr.msk.f32.vlgmr.msra.gmra.mrb[8].mxu1 %vm338_vm6, %v4906_v1  ;;  %v870_v10 = vpop.permute.xlu1 %869 }
 0x3f3   :  { %4311 = vmatmul.mubr.msk.f32.vlgmr.msra.gmra.mrb[6].mxu0 %vm338_vm6, %v4902_v0  ;;  %4314 = vmatpush3.xpose.msk.msra.mxu1 %vm338_vm6, %v870_v10 }
 0x3f4   :  { %4315 = vmatprep.mubr.msk.f32.mxu1 %vm4755_vm5, %v4754_v58  ;;  %4323 = vmatprep.subr.mxu1 %v4754_v58 }
 0x3f5   :  { %4320 = vmatprep.mubr.msk.f32.mxu0 %vm4755_vm5, %v4754_v58 }
 0x3f6   :  { %4316 = vmatmul.mubr.msk.f32.vlgmr.msra.gmra.mrb[10].mxu1 %vm338_vm6, %v4914_v3 }
 0x3f7   :  { %4325 = vmatprep.mubr.msk.f32.mxu1 %vm4755_vm5, %v4754_v58 }
 0x453   :  { %v409_v11 = vpop.f32.mrb[0].mxu0 }
 0x454   :  { %v4282_v14 = vpop.f32.mrb[1].mxu0  ;;  %v945_v15 = vsel %vm338_vm6, %v409_v11, -inf }
 0x455   :  { %946 = vmax.xlane.f32.xlu0 %v945_v15 }
 0x45a   :  { %v485_v16 = vpop.f32.mrb[4].mxu1 }
 0x45b   :  { %v4287_v17 = vpop.f32.mrb[5].mxu1  ;;  %v948_v18 = vsel %vm338_vm6, %v485_v16, -inf }
 0x45c   :  { %949 = vmax.xlane.f32.xlu1 %v948_v18 }
 0x4bd   :  { %v637_v19 = vpop.f32.mrb[6].mxu1 }
 0x4be   :  { %v561_v20 = vpop.f32.mrb[2].mxu0  ;;  %v4297_v21 = vpop.f32.mrb[7].mxu1  ;;  %v954_v22 = vsel %vm338_vm6, %v637_v19, -inf }
 0x4bf   :  { %955 = vmax.xlane.f32.xlu0 %v954_v22  ;;  %v4292_v23 = vpop.f32.mrb[3].mxu0  ;;  %v951_v25 = vsel %vm338_vm6, %v561_v20, -inf }
 0x4c2   :  { %v713_v24 = vpop.f32.mrb[4].mxu0 }
 0x4c3   :  { %952 = vmax.xlane.f32.xlu0 %v951_v25  ;;  %v4302_v26 = vpop.f32.mrb[5].mxu0  ;;  %v957_v33 = vsel %vm338_vm6, %v713_v24, -inf }
 0x4c5   :  { %v789_v27 = vpop.f32.mrb[8].mxu1 }
 0x4c6   :  { %v4307_v28 = vpop.f32.mrb[9].mxu1  ;;  %v865_v30 = vpop.f32.mrb[6].mxu0  ;;  %v960_v32 = vsel %vm338_vm6, %v789_v27, -inf }
 0x4c7   :  { %961 = vmax.xlane.f32.xlu1 %v960_v32  ;;  %958 = vmax.xlane.f32.xlu0 %v957_v33  ;;  %v4312_v34 = vpop.f32.mrb[7].mxu0  ;;  %v963_v38 = vsel %vm338_vm6, %v865_v30, -inf }
 0x4c9   :  { %v941_v35 = vpop.f32.mrb[10].mxu1 }
 0x4ca   :  { %v4317_v36 = vpop.f32.mrb[11].mxu1  ;;  %v966_v37 = vsel %vm338_vm6, %v941_v35, -inf }
 0x4cb   :  { %967 = vmax.xlane.f32.xlu1 %v966_v37  ;;  %964 = vmax.xlane.f32.xlu0 %v963_v38 }
 0x4dc   :  { %1109 = vrot.lane.b32.xlu1 %v4872_v59, %s4760_s20 }
 0x4e0   :  { %1185 = vrot.lane.b32.xlu1 %v4896_v62, %s4760_s20 }
 0x4e1   :  { %1033 = vrot.lane.b32.xlu0 %v4876_v60, %s4760_s20 }
 0x4e2   :  { %v947_v39 = vpop.xlane.xlu0 %946 }
 0x4e3   :  { %v969_v40 = vsub.f32 %v409_v11, %v947_v39 }
 0x4e4   :  { %1261 = vrot.lane.b32.xlu1 %v4892_v61, %s4760_s20 }
 0x4e5   :  { %1337 = vrot.lane.b32.xlu0 %v4900_v63, %s4760_s20  ;;  %v977_v41 = vmul.f32 1.442695, %v969_v40 }
 0x4e7   :  { %4642 = vpow2.f32 %v977_v41 }
 0x4e8   :  { %1413 = vrot.lane.b32.xlu1 %v4906_v1, %s4760_s20 }
 0x4e9   :  { %v950_v42 = vpop.xlane.xlu1 %949 }
 0x4ea   :  { %v970_v43 = vsub.f32 %v485_v16, %v950_v42 }
 0x4ec   :  { %v979_v44 = vmul.f32 1.442695, %v970_v43 }
 0x4ee   :  { %4644 = vpow2.f32 %v979_v44 }
 0x4f1   :  { %v4984_v45 = vpop.eup %4642 }
 0x4f2   :  { %v993_v46 = vsel %vm338_vm6, %v4984_v45, 0.0 }
 0x4f8   :  { %v4988_v47 = vpop.eup %4644 }
 0x4f9   :  { %v996_v49 = vsel %vm338_vm6, %v4988_v47, 0.0 }
 0x504   :  { %994 = vadd.xlane.f32.xlu0 %v993_v46 }
 0x50c   :  { %997 = vadd.xlane.f32.xlu1 %v996_v49 }
 0x54c   :  { %v956_v50 = vpop.xlane.xlu0 %955 }
 0x54d   :  { %v972_v52 = vsub.f32 %v637_v19, %v956_v50 }
 0x54f   :  { %v983_v53 = vmul.f32 1.442695, %v972_v52 }
 0x550   :  { %v953_v54 = vpop.xlane.xlu0 %952 }
 0x551   :  { %4646 = vpow2.f32 %v983_v53  ;;  %v971_v55 = vsub.f32 %v561_v20, %v953_v54 }
 0x553   :  { %v981_v56 = vmul.f32 1.442695, %v971_v55 }
 0x554   :  { %v962_v57 = vpop.xlane.xlu1 %961  ;;  %v959_v59 = vpop.xlane.xlu0 %958 }
 0x555   :  { %4648 = vpow2.f32 %v981_v56  ;;  %v974_v60 = vsub.f32 %v789_v27, %v962_v57  ;;  %v973_v61 = vsub.f32 %v713_v24, %v959_v59 }
 0x557   :  { %v987_v62 = vmul.f32 1.442695, %v974_v60  ;;  %v985_v63 = vmul.f32 1.442695, %v973_v61  ;;  %v1673_v61 = vld [vmem:[%s5533_s2 + $0x10] sm:$0xff] }
 0x558   :  { %v968_v1 = vpop.xlane.xlu1 %967  ;;  %v965_v2 = vpop.xlane.xlu0 %964 }
 0x559   :  { %4650 = vpow2.f32 %v987_v62  ;;  %v976_v4 = vsub.f32 %v941_v35, %v968_v1  ;;  %v975_v5 = vsub.f32 %v865_v30, %v965_v2  ;;  %v1674_v62 = vld [vmem:[%s5533_s2 + $0x38] sm:$0xff]  ;;  %v1675_v1 = vld [vmem:[%s5533_s2 + $0x60] sm:$0xff]  ;;  %v1676_v2 = vld [vmem:[%s5533_s2 + $0x88] sm:$0xff] }
 0x55a   :  { %4652 = vpow2.f32 %v985_v63  ;;  %v5044_v63 = vpack.c.bf16 %v1674_v62, %v1673_v61  ;;  %v1910_v62 = vld [vmem:[%s5533_s2 + $0xc0] sm:$0xff] }
 0x55b   :  { %v4647_v6 = vpop.eup %4646  ;;  %v991_v7 = vmul.f32 1.442695, %v976_v4  ;;  %v989_v8 = vmul.f32 1.442695, %v975_v5  ;;  %v5054_v4 = vpack.c.bf16 %v1676_v2, %v1675_v1  ;;  %v1911_v1 = vld [vmem:[%s5533_s2 + $0xe8] sm:$0xff] }
 0x55c   :  { %v1110_v9 = vpop.permute.xlu1 %1109  ;;  %v1034_v10 = vpop.permute.xlu0 %1033  ;;  %v1002_v11 = vsel %vm338_vm6, %v4647_v6, 0.0  ;;  %v4571_v2 = vpack.c.bf16 %v1911_v1, %v1910_v62 }
 0x55d   :  { %4654 = vpow2.f32 %v991_v7  ;;  %4324 = vmatpush3.msra.mxu1 %v1110_v9  ;;  %1003 = vadd.xlane.f32.xlu1 %v1002_v11 }
 0x55e   :  { %4656 = vpow2.f32 %v989_v8  ;;  %4319 = vmatpush3.msra.mxu0 %v1034_v10  ;;  %4333 = vmatprep.subr.mxu1 %v4754_v58 }
 0x55f   :  { %v4649_v14 = vpop.eup %4648  ;;  %4328 = vmatprep.subr.mxu0 %v4754_v58 }
 0x560   :  { %v999_v15 = vsel %vm338_vm6, %v4649_v14, 0.0  ;;  %v1186_v24 = vpop.permute.xlu1 %1185  ;;  %v1338_v25 = vpop.permute.xlu0 %1337 }
 0x561   :  { %1000 = vadd.xlane.f32.xlu0 %v999_v15 }
 0x563   :  { %v4651_v16 = vpop.eup %4650 }
 0x564   :  { %v4653_v17 = vpop.eup %4652  ;;  %v1008_v18 = vsel %vm338_vm6, %v4651_v16, 0.0  ;;  %v1262_v26 = vpop.permute.xlu1 %1261 }
 0x565   :  { %1009 = vadd.xlane.f32.xlu1 %v1008_v18  ;;  %v1005_v19 = vsel %vm338_vm6, %v4653_v17, 0.0 }
 0x566   :  { %1006 = vadd.xlane.f32.xlu0 %v1005_v19 }
 0x567   :  { %v4998_v20 = vpop.eup %4654 }
 0x568   :  { %v5000_v21 = vpop.eup %4656  ;;  %v1014_v22 = vsel %vm338_vm6, %v4998_v20, 0.0  ;;  %v1414_v28 = vpop.permute.xlu1 %1413 }
 0x569   :  { %1015 = vadd.xlane.f32.xlu1 %v1014_v22  ;;  %v1011_v23 = vsel %vm338_vm6, %v5000_v21, 0.0 }
 0x56a   :  { %1012 = vadd.xlane.f32.xlu0 %v1011_v23 }
 0x57a   :  { %1565 = vrot.lane.b32.xlu1 %v4914_v3, %s4760_s20 }
 0x580   :  { %1489 = vrot.lane.b32.xlu0 %v4902_v0, %s4760_s20 }
 0x591   :  { %v995_v27 = vpop.xlane.xlu0 %994 }
 0x592   :  { %4658 = vrcp.f32 %v995_v27 }
 0x599   :  { %v998_v30 = vpop.xlane.xlu1 %997 }
 0x59a   :  { %4660 = vrcp.f32 %v998_v30 }
 0x59c   :  { %v4659_v32 = vpop.eup %4658 }
 0x59d   :  { %v1025_v33 = vmul.f32 %v4659_v32, %v4984_v45 }
 0x59f   :  { %4321 = vmatmul.mubr.msk.f32.vlgmr.msra.gmra.mrb[8].mxu0 %vm338_vm6, %v1025_v33 }
 0x5a0   :  { %4329 = vmatpush3.msra.mxu0 %v1186_v24  ;;  %4330 = vmatprep.mubr.msk.f32.mxu0 %vm4755_vm5, %v4754_v58 }
 0x5a1   :  { %4338 = vmatprep.subr.mxu0 %v4754_v58 }
 0x5a4   :  { %v4661_v0 = vpop.eup %4660 }
 0x5a5   :  { %v1026_v3 = vmul.f32 %v4661_v0, %v4988_v47 }
 0x5a7   :  { %4326 = vmatmul.mubr.msk.f32.vlgmr.msra.gmra.mrb[12].mxu1 %vm338_vm6, %v1026_v3 }
 0x5a8   :  { %4334 = vmatpush3.msra.mxu1 %v1262_v26  ;;  %4335 = vmatprep.mubr.msk.f32.mxu1 %vm4755_vm5, %v4754_v58 }
 0x5a9   :  { %4343 = vmatprep.subr.mxu1 %v4754_v58 }
 0x5ea   :  { %v1004_v34 = vpop.xlane.xlu1 %1003 }
 0x5eb   :  { %4662 = vrcp.f32 %v1004_v34 }
 0x5ee   :  { %v1001_v35 = vpop.xlane.xlu0 %1000 }
 0x5ef   :  { %4664 = vrcp.f32 %v1001_v35 }
 0x5f2   :  { %v1010_v36 = vpop.xlane.xlu1 %1009 }
 0x5f3   :  { %4666 = vrcp.f32 %v1010_v36  ;;  %v1007_v37 = vpop.xlane.xlu0 %1006 }
 0x5f4   :  { %4668 = vrcp.f32 %v1007_v37 }
 0x5f5   :  { %v4663_v38 = vpop.eup %4662 }
 0x5f6   :  { %v1028_v39 = vmul.f32 %v4663_v38, %v4647_v6  ;;  %v1016_v40 = vpop.xlane.xlu1 %1015 }
 0x5f7   :  { %4670 = vrcp.f32 %v1016_v40  ;;  %v1013_v41 = vpop.xlane.xlu0 %1012 }
 0x5f8   :  { %4672 = vrcp.f32 %v1013_v41  ;;  %4336 = vmatmul.mubr.msk.f32.vlgmr.msra.gmra.mrb[14].mxu1 %vm338_vm6, %v1028_v39 }
 0x5f9   :  { %v4665_v42 = vpop.eup %4664  ;;  %4344 = vmatpush3.msra.mxu1 %v1414_v28  ;;  %4345 = vmatprep.mubr.msk.f32.mxu1 %vm4755_vm5, %v4754_v58 }
 0x5fa   :  { %v1027_v43 = vmul.f32 %v4665_v42, %v4649_v14  ;;  %4353 = vmatprep.subr.mxu1 %v4754_v58  ;;  %v1566_v49 = vpop.permute.xlu1 %1565 }
 0x5fb   :  { %v1490_v52 = vpop.permute.xlu0 %1489 }
 0x5fc   :  { %4331 = vmatmul.mubr.msk.f32.vlgmr.msra.gmra.mrb[10].mxu0 %vm338_vm6, %v1027_v43 }
 0x5fd   :  { %v4667_v44 = vpop.eup %4666  ;;  %4339 = vmatpush3.msra.mxu0 %v1338_v25  ;;  %4340 = vmatprep.mubr.msk.f32.mxu0 %vm4755_vm5, %v4754_v58 }
 0x5fe   :  { %v4669_v45 = vpop.eup %4668  ;;  %v1030_v46 = vmul.f32 %v4667_v44, %v4651_v16  ;;  %4348 = vmatprep.subr.mxu0 %v4754_v58 }
 0x5ff   :  { %v1029_v47 = vmul.f32 %v4669_v45, %v4653_v17 }
 0x600   :  { %4346 = vmatmul.mubr.msk.f32.vlgmr.msra.gmra.mrb[16].mxu1 %vm338_vm6, %v1030_v46 }
 0x601   :  { %v4671_v50 = vpop.eup %4670  ;;  %4341 = vmatmul.mubr.msk.f32.vlgmr.msra.gmra.mrb[12].mxu0 %vm338_vm6, %v1029_v47  ;;  %4354 = vmatpush3.msra.mxu1 %v1566_v49  ;;  %v1814_v47 = vld [vmem:[%s5533_s2 + $0x18] sm:$0xff]  ;;  %v1815_v49 = vld [vmem:[%s5533_s2 + $0x40] sm:$0xff] }
 0x602   :  { %v4673_v53 = vpop.eup %4672  ;;  %v1032_v54 = vmul.f32 %v4671_v50, %v4998_v20  ;;  %4349 = vmatpush3.msra.mxu0 %v1490_v52  ;;  %4350 = vmatprep.mubr.msk.f32.mxu0 %vm4755_vm5, %v4754_v58  ;;  %v1816_v50 = vld [vmem:[%s5533_s2 + $0x68] sm:$0xff]  ;;  %v5099_v52 = vpack.c.bf16 %v1815_v49, %v1814_v47  ;;  %v4081_v47 = vld [vmem:[%s5535_s1 + $0x18] sm:$0xff] }
 0x603   :  { %v1031_v55 = vmul.f32 %v4673_v53, %v5000_v21  ;;  %4355 = vmatprep.mubr.msk.f32.mxu1 %vm4755_vm5, %v4754_v58  ;;  %4548 = vmatprep.subr.bf16.mxu0 %v5044_v63  ;;  %v1817_v53 = vld [vmem:[%s5533_s2 + $0x90] sm:$0xff] }
 0x604   :  { %4356 = vmatmul.mubr.msk.f32.vlgmr.msra.gmra.mrb[18].mxu1 %vm338_vm6, %v1032_v54  ;;  %v5104_v54 = vpack.c.bf16 %v1817_v53, %v1816_v50  ;;  %4556 = vmatprep.subr.bf16.mxu1 %v5099_v52  ;;  %v4080_v53 = vld [vmem:[%s5535_s1 + $0x10] sm:$0xff] }
 0x605   :  { %4351 = vmatmul.mubr.msk.f32.vlgmr.msra.gmra.mrb[14].mxu0 %vm338_vm6, %v1031_v55  ;;  %4558 = vmatpush3.bf16.msra.mxu1 %v5099_v52  ;;  %v1906_v55 = vld [vmem:[%s5533_s2 + $0x20] sm:$0xff] }
 0x606   :  { %4550 = vmatpush3.bf16.msra.mxu0 %v5044_v63  ;;  %4560 = vmatprep.subr.bf16.mxu1 %v5104_v54 }
 0x607   :  { %4552 = vmatprep.subr.bf16.mxu0 %v5054_v4 }
 0x609   :  { %4562 = vmatpush3.bf16.msra.mxu1 %v5104_v54 }
 0x60a   :  { %4554 = vmatpush3.bf16.msra.mxu0 %v5054_v4  ;;  %4580 = vmatprep.subr.bf16.mxu1 %v4839_v29 }
 0x672   :  { %v1105_v56 = vpop.f32.mrb[8].mxu0 }
 0x673   :  { %v4322_v57 = vpop.f32.mrb[9].mxu0 }
 0x674   :  { %v1908_v57 = vld [vmem:[%s5533_s2 + $0x70] sm:$0xff] }
 0x67a   :  { %v1181_v59 = vpop.f32.mrb[12].mxu1 }
 0x67b   :  { %v4327_v60 = vpop.f32.mrb[13].mxu1 }
 0x67c   :  { %v1909_v60 = vld [vmem:[%s5533_s2 + $0x98] sm:$0xff] }
 0x67d   :  { %v4567_v61 = vpack.c.bf16 %v1909_v60, %v1908_v57 }
 0x6cb   :  { %v1333_v5 = vpop.f32.mrb[14].mxu1 }
 0x6cc   :  { %1645 = vrot.lane.b32.xlu1 %v1333_v5, %s4761_s29  ;;  %v4337_v6 = vpop.f32.mrb[15].mxu1 }
 0x6cf   :  { %v1257_v7 = vpop.f32.mrb[10].mxu0 }
 0x6d0   :  { %1643 = vrot.lane.b32.xlu0 %v1257_v7, %s4761_s29  ;;  %v4332_v8 = vpop.f32.mrb[11].mxu0 }
 0x6d3   :  { %v1485_v9 = vpop.f32.mrb[16].mxu1 }
 0x6d4   :  { %v1409_v10 = vpop.f32.mrb[12].mxu0  ;;  %1653 = vrot.lane.b32.xlu1 %v1485_v9, %s4762_s30  ;;  %v4347_v11 = vpop.f32.mrb[17].mxu1 }
 0x6d5   :  { %1651 = vrot.lane.b32.xlu0 %v1409_v10, %s4762_s30  ;;  %v4342_v14 = vpop.f32.mrb[13].mxu0 }
 0x6d7   :  { %v1637_v15 = vpop.f32.mrb[18].mxu1 }
 0x6d8   :  { %v1561_v16 = vpop.f32.mrb[14].mxu0  ;;  %1661 = vrot.lane.b32.xlu1 %v1637_v15, %s4763_s0  ;;  %v4357_v17 = vpop.f32.mrb[19].mxu1 }
 0x6d9   :  { %1659 = vrot.lane.b32.xlu0 %v1561_v16, %s4763_s0  ;;  %v4352_v18 = vpop.f32.mrb[15].mxu0 }
 0x73e   :  { %v1646_v19 = vpop.permute.xlu1 %1645 }
 0x73f   :  { %v1666_v23 = vsel %vm338_vm6, %v1181_v59, %v1646_v19 }
 0x742   :  { %v1644_v20 = vpop.permute.xlu0 %1643 }
 0x743   :  { %v1665_v24 = vsel %vm338_vm6, %v1105_v56, %v1644_v20  ;;  %v1907_v56 = vld [vmem:[%s5533_s2 + $0x48] sm:$0xff] }
 0x744   :  { %v4563_v59 = vpack.c.bf16 %v1907_v56, %v1906_v55 }
 0x746   :  { %v1654_v21 = vpop.permute.xlu1 %1653  ;;  %4564 = vmatprep.subr.bf16.mxu0 %v4563_v59 }
 0x747   :  { %v1652_v22 = vpop.permute.xlu0 %1651  ;;  %v1669_v25 = vsel %vm1667_vm7, %v1666_v23, %v1654_v21  ;;  %v5132_v23 = vld [vmem:[%s5536_s3 + $0x2] ss:$0 sm:$0xff] }
 0x748   :  { %v1668_v27 = vsel %vm1667_vm7, %v1665_v24, %v1652_v22 }
 0x74a   :  { %v1662_v26 = vpop.permute.xlu1 %1661 }
 0x74b   :  { %v1672_v28 = vsel %vm1670_vm8, %v1669_v25, %v1662_v26  ;;  %v1660_v30 = vpop.permute.xlu0 %1659  ;;  %v5138_v26 = vld [vmem:[%s5536_s3 + $0x3] ss:$0 sm:$0xff] }
 0x74c   :  { %v1671_v32 = vsel %vm1670_vm8, %v1668_v27, %v1660_v30 }
 0x74d   :  { %4366 = vmatprep.mubr.msk.f32.mxu0 %vm27_vm0, %v1671_v32 }
 0x74e   :  { %4367 = vmatmul.mubr.msk.f32.vlgmr.msra.gmra.mrb[16].mxu0 %vm27_vm0, %v1672_v28 }
 0x74f   :  { %4566 = vmatpush3.bf16.msra.mxu0 %v4563_v59 }
 0x750   :  { %4568 = vmatprep.subr.bf16.mxu0 %v4567_v61 }
 0x753   :  { %4570 = vmatpush3.bf16.msra.mxu0 %v4567_v61 }
 0x754   :  { %4572 = vmatprep.subr.bf16.mxu0 %v4571_v2 }
 0x757   :  { %4574 = vmatpush3.bf16.msra.mxu0 %v4571_v2 }
 0x821   :  { %v4368_v33 = vpop.f32.mrb[16].mxu0 }
 0x822   :  { %v5073_v0 = vadd.f32 %v4368_v33, %v4820_v13  ;;  %v1749_v3 = vpop.f32.mrb[17].mxu0 }
 0x823   :  { %v5076_v34 = vadd.f32 %v1749_v3, %v4818_v12 }
 0x824   :  { %v1765_v35 = vsel %vm27_vm0, %v5073_v0, 0.0 }
 0x825   :  { %1766 = vadd.xlane.f32.xlu1 %v1765_v35  ;;  %v1762_v36 = vsel %vm27_vm0, %v5076_v34, 0.0  ;;  %v1912_v35 = vld [vmem:[%s5533_s2 + $0x110] sm:$0xff] }
 0x826   :  { %1763 = vadd.xlane.f32.xlu0 %v1762_v36  ;;  %v1913_v36 = vld [vmem:[%s5533_s2 + $0x138] sm:$0xff] }
 0x8b2   :  { %v1767_v37 = vpop.xlane.xlu1 %1766 }
 0x8b3   :  { %v1769_v38 = vmul.f32 0.03125, %v1767_v37  ;;  %v1764_v39 = vpop.xlane.xlu0 %1763  ;;  %v4575_v37 = vpack.c.bf16 %v1913_v36, %v1912_v35 }
 0x8b4   :  { %v1768_v40 = vmul.f32 0.03125, %v1764_v39 }
 0x8b5   :  { %v5083_v41 = vsub.f32 %v5073_v0, %v1769_v38  ;;  %4576 = vmatprep.subr.bf16.mxu0 %v4575_v37 }
 0x8b6   :  { %v1770_v42 = vsub.f32 %v5076_v34, %v1768_v40  ;;  %4578 = vmatpush3.bf16.msra.mxu0 %v4575_v37 }
 0x8b7   :  { %v1773_v45 = vmul.f32 %v5083_v41, %v5083_v41  ;;  %v1805_v28 = vmul.f32 %v5132_v23, %v5083_v41  ;;  %4420 = vmatprep.subr.mxu0 %v4754_v58 }
 0x8b8   :  { %v1772_v43 = vmul.f32 %v1770_v42, %v1770_v42  ;;  %v1804_v24 = vmul.f32 %v5132_v23, %v1770_v42 }
 0x8b9   :  { %v1777_v46 = vsel %vm27_vm0, %v1773_v45, 0.0 }
 0x8ba   :  { %v1774_v44 = vsel %vm27_vm0, %v1772_v43, 0.0 }
 0x8bb   :  { %1775 = vadd.xlane.f32.xlu0 %v1774_v44  ;;  %v4079_v44 = vld [vmem:[%s5536_s3 + $0x6] ss:$0 sm:$0xff] }
 0x8bf   :  { %1778 = vadd.xlane.f32.xlu0 %v1777_v46 }
 0x948   :  { %v1776_v5 = vpop.xlane.xlu0 %1775 }
 0x949   :  { %v1780_v6 = vmul.f32 0.032258064, %v1776_v5 }
 0x94b   :  { %4674 = vrsqrt.f32 %v1780_v6  ;;  %vm1784_vm9 = vcmp.eq.f32.partialorder %v1780_v6, inf  ;;  %v1787_v11 = vand.u32 2147483648, %v1780_v6  ;;  %vm1786_vm10 = vcmp.eq.f32.partialorder %v1780_v6, 0.0 }
 0x94c   :  { %v1779_v7 = vpop.xlane.xlu0 %1778 }
 0x94d   :  { %v1781_v8 = vmul.f32 0.032258064, %v1779_v7 }
 0x94f   :  { %4676 = vrsqrt.f32 %v1781_v8  ;;  %vm1791_vm11 = vcmp.eq.f32.partialorder %v1781_v8, inf  ;;  %v1794_v19 = vand.u32 2147483648, %v1781_v8  ;;  %vm1793_vm12 = vcmp.eq.f32.partialorder %v1781_v8, 0.0 }
 0x955   :  { %v4675_v9 = vpop.eup %4674 }
 0x956   :  { %v1783_v10 = vmul.f32 %v4675_v9, %v1780_v6 }
 0x958   :  { %v1785_v14 = vsel %vm1784_vm9, %v1780_v6, %v1783_v10 }
 0x959   :  { %v4677_v15 = vpop.eup %4676  ;;  %v1788_v16 = vsel %vm1786_vm10, %v1787_v11, %v1785_v14 }
 0x95a   :  { %v1790_v17 = vmul.f32 %v4677_v15, %v1781_v8  ;;  %v1796_v18 = vadd.f32 1e-06, %v1788_v16 }
 0x95c   :  { %v1792_v20 = vsel %vm1791_vm11, %v1781_v8, %v1790_v17  ;;  %4678 = vrcp.f32 %v1796_v18 }
 0x95d   :  { %v1795_v21 = vsel %vm1793_vm12, %v1794_v19, %v1792_v20 }
 0x95e   :  { %v1797_v22 = vadd.f32 1e-06, %v1795_v21 }
 0x960   :  { %4680 = vrcp.f32 %v1797_v22 }
 0x966   :  { %v4679_v25 = vpop.eup %4678 }
 0x967   :  { %v1806_v27 = vmul.f32 %v4679_v25, %v1804_v24 }
 0x969   :  { %v1812_v30 = vadd.f32 %v5138_v26, %v1806_v27 }
 0x96a   :  { %v4681_v32 = vpop.eup %4680 }
 0x96b   :  { %v1807_v33 = vmul.f32 %v4681_v32, %v1805_v28  ;;  %4377 = vmatprep.mubr.msk.f32.mxu1 %vm27_vm0, %v1812_v30 }
 0x96d   :  { %v1813_v3 = vadd.f32 %v5138_v26, %v1807_v33 }
 0x96f   :  { %4378 = vmatmul.mubr.msk.f32.vlgmr.msra.gmra.mrb[20].mxu1 %vm27_vm0, %v1813_v3 }
 0x970   :  { %4582 = vmatpush3.bf16.msra.mxu1 %v4839_v29  ;;  %v4074_v29 = vld [vmem:[%s5536_s3 + $0x8] ss:$0 sm:$0xff] }
 0x971   :  { %4584 = vmatprep.subr.bf16.mxu1 %v4844_v31 }
 0x974   :  { %4586 = vmatpush3.bf16.msra.mxu1 %v4844_v31 }
 0x975   :  { %4410 = vmatprep.subr.mxu1 %v4754_v58 }
 0xa42   :  { %v4379_v31 = vpop.f32.mrb[20].mxu1 }
 0xa43   :  { %v1901_v38 = vadd.f32 %v4379_v31, %v4074_v29  ;;  %v1895_v39 = vpop.f32.mrb[21].mxu1 }
 0xa44   :  { %v1896_v40 = vadd.f32 %v4074_v29, %v1895_v39 }
 0xa45   :  { %v1905_v42 = vmax.f32 %v1901_v38, 0.0 }
 0xa46   :  { %v1904_v41 = vmax.f32 %v1896_v40, 0.0 }
 0xa48   :  { %4396 = vmatprep.mubr.msk.f32.mxu0 %vm1914_vm13, %v1904_v41 }
 0xa49   :  { %4397 = vmatmul.mubr.msk.f32.vlgmr.msra.gmra.mrb[18].mxu0 %vm1914_vm13, %v1905_v42 }
 0xa4a   :  { %4422 = vmatprep.mubr.msk.f32.mxu0 %vm4755_vm5, %v4754_v58 }
 0xb1c   :  { %v4398_v43 = vpop.f32.mrb[18].mxu0 }
 0xb1d   :  { %v1997_v45 = vadd.f32 %v4398_v43, %v5073_v0  ;;  %v1987_v46 = vpop.f32.mrb[19].mxu0 }
 0xb1e   :  { %v1996_v49 = vadd.f32 %v1987_v46, %v5076_v34 }
 0xb1f   :  { %v5172_v50 = vadd.f32 %v4079_v44, %v1997_v45 }
 0xb20   :  { %v5177_v55 = vadd.f32 %v4079_v44, %v1996_v49 }
 0xb21   :  { %v5180_v56 = vadd.f32 %v4081_v47, %v5172_v50 }
 0xb22   :  { %v5183_v0 = vadd.f32 %v4080_v53, %v5177_v55 }
 0xb23   :  { %v2109_v57 = vsel %vm27_vm0, %v5180_v56, 0.0 }
 0xb24   :  { %2110 = vadd.xlane.f32.xlu1 %v2109_v57  ;;  %v2106_v34 = vsel %vm27_vm0, %v5183_v0, 0.0 }
 0xb25   :  { %2107 = vadd.xlane.f32.xlu0 %v2106_v34 }
 0xbb1   :  { %v2111_v59 = vpop.xlane.xlu1 %2110 }
 0xbb2   :  { %v2113_v60 = vmul.f32 0.03125, %v2111_v59  ;;  %v2108_v61 = vpop.xlane.xlu0 %2107 }
 0xbb3   :  { %v2112_v62 = vmul.f32 0.03125, %v2108_v61 }
 0xbb4   :  { %v2115_v1 = vsub.f32 %v5180_v56, %v2113_v60 }
 0xbb5   :  { %v2114_v2 = vsub.f32 %v5183_v0, %v2112_v62 }
 0xbb6   :  { %v2117_v5 = vmul.f32 %v2115_v1, %v2115_v1  ;;  %v2149_v30 = vmul.f32 %v4853_v48, %v2115_v1 }
 0xbb7   :  { %v2116_v6 = vmul.f32 %v2114_v2, %v2114_v2  ;;  %v2148_v33 = vmul.f32 %v4853_v48, %v2114_v2 }
 0xbb8   :  { %v2121_v7 = vsel %vm27_vm0, %v2117_v5, 0.0 }
 0xbb9   :  { %2122 = vadd.xlane.f32.xlu1 %v2121_v7  ;;  %v2118_v8 = vsel %vm27_vm0, %v2116_v6, 0.0 }
 0xbba   :  { %2119 = vadd.xlane.f32.xlu0 %v2118_v8 }
 0xc46   :  { %v2123_v9 = vpop.xlane.xlu1 %2122 }
 0xc47   :  { %v2125_v10 = vmul.f32 0.032258064, %v2123_v9  ;;  %v2120_v11 = vpop.xlane.xlu0 %2119 }
 0xc48   :  { %v2124_v14 = vmul.f32 0.032258064, %v2120_v11 }
 0xc49   :  { %4682 = vrsqrt.f32 %v2125_v10  ;;  %vm2135_vm14 = vcmp.eq.f32.partialorder %v2125_v10, inf  ;;  %v2138_v18 = vand.u32 2147483648, %v2125_v10  ;;  %vm2137_vm15 = vcmp.eq.f32.partialorder %v2125_v10, 0.0 }
 0xc4a   :  { %4684 = vrsqrt.f32 %v2124_v14  ;;  %vm2128_vm1 = vcmp.eq.f32.partialorder %v2124_v14, inf  ;;  %v2131_v21 = vand.u32 2147483648, %v2124_v14  ;;  %vm2130_vm2 = vcmp.eq.f32.partialorder %v2124_v14, 0.0 }
 0xc53   :  { %v4683_v15 = vpop.eup %4682 }
 0xc54   :  { %v4685_v16 = vpop.eup %4684  ;;  %v2134_v17 = vmul.f32 %v4683_v15, %v2125_v10 }
 0xc55   :  { %v2127_v19 = vmul.f32 %v4685_v16, %v2124_v14 }
 0xc56   :  { %v2136_v20 = vsel %vm2135_vm14, %v2125_v10, %v2134_v17 }
 0xc57   :  { %v2139_v22 = vsel %vm2137_vm15, %v2138_v18, %v2136_v20  ;;  %v2129_v24 = vsel %vm2128_vm1, %v2124_v14, %v2127_v19 }
 0xc58   :  { %v2141_v25 = vadd.f32 1e-06, %v2139_v22  ;;  %v2132_v27 = vsel %vm2130_vm2, %v2131_v21, %v2129_v24 }
 0xc59   :  { %v2140_v28 = vadd.f32 1e-06, %v2132_v27 }
 0xc5a   :  { %4686 = vrcp.f32 %v2141_v25 }
 0xc5b   :  { %4688 = vrcp.f32 %v2140_v28 }
 0xc64   :  { %v4687_v32 = vpop.eup %4686 }
 0xc65   :  { %v4689_v3 = vpop.eup %4688  ;;  %v2151_v35 = vmul.f32 %v4687_v32, %v2149_v30 }
 0xc66   :  { %v2150_v36 = vmul.f32 %v4689_v3, %v2148_v33 }
 0xc67   :  { %v2157_v29 = vadd.f32 %v4859_v51, %v2151_v35 }
 0xc68   :  { %v2156_v37 = vadd.f32 %v4859_v51, %v2150_v36 }
 0xc6a   :  { %4407 = vmatprep.mubr.msk.f32.mxu1 %vm27_vm0, %v2156_v37 }
 0xc6b   :  { %4408 = vmatmul.mubr.msk.f32.vlgmr.msra.gmra.mrb[22].mxu1 %vm27_vm0, %v2157_v29 }
 0xc6c   :  { %4412 = vmatprep.mubr.msk.f32.mxu1 %vm4755_vm5, %v4754_v58 }
 0xd3e   :  { %v5201_v31 = vpop.f32.mrb[22].mxu1 }
 0xd3f   :  { %2247 = vrot.lane.b32.xlu1 %v5201_v31, %s4756_s16  ;;  %v5205_v48 = vpop.f32.mrb[23].mxu1 }
 0xd40   :  { %2245 = vrot.lane.b32.xlu0 %v5205_v48, %s4756_s16 }
 0xd43   :  { %2249 = vrot.lane.b32.xlu1 %v5205_v48, %s4757_s17 }
 0xd44   :  { %2253 = vrot.lane.b32.xlu0 %v5205_v48, %s4758_s18 }
 0xd47   :  { %2251 = vrot.lane.b32.xlu1 %v5201_v31, %s4757_s17 }
 0xd48   :  { %2257 = vrot.lane.b32.xlu0 %v5205_v48, %s4759_s19 }
 0xd4b   :  { %2255 = vrot.lane.b32.xlu1 %v5201_v31, %s4758_s18 }
 0xd4f   :  { %2333 = vrot.lane.b32.xlu1 %v5201_v31, %s4759_s19 }
 0xdb1   :  { %v5221_v51 = vpop.permute.xlu1 %2247 }
 0xdb2   :  { %2485 = vrot.lane.b32.xlu1 %v5221_v51, %s4759_s19  ;;  %v5225_v38 = vpop.permute.xlu0 %2245 }
 0xdb3   :  { %2409 = vrot.lane.b32.xlu0 %v5225_v38, %s4759_s19 }
 0xdb5   :  { %v5229_v39 = vpop.permute.xlu1 %2249 }
 0xdb6   :  { %v5231_v40 = vpop.permute.xlu0 %2253 }
 0xdb7   :  { %2561 = vrot.lane.b32.xlu0 %v5229_v39, %s4759_s19 }
 0xdb9   :  { %v5235_v41 = vpop.permute.xlu1 %2251 }
 0xdba   :  { %2637 = vrot.lane.b32.xlu1 %v5235_v41, %s4759_s19  ;;  %v2258_v42 = vpop.permute.xlu0 %2257 }
 0xdbb   :  { %2713 = vrot.lane.b32.xlu0 %v5231_v40, %s4759_s19  ;;  %4411 = vmatpush3.xpose.msk.msra.mxu1 %vm338_vm6, %v2258_v42 }
 0xdbc   :  { %4415 = vmatprep.subr.mxu1 %v4754_v58 }
 0xdbd   :  { %v5243_v43 = vpop.permute.xlu1 %2255 }
 0xdbe   :  { %2789 = vrot.lane.b32.xlu1 %v5243_v43, %s4759_s19  ;;  %4413 = vmatmul.mubr.msk.f32.vlgmr.msra.gmra.mrb[24].mxu1 %vm338_vm6, %v5205_v48 }
 0xdbf   :  { %4417 = vmatprep.mubr.msk.f32.mxu1 %vm4755_vm5, %v4754_v58 }
 0xdc1   :  { %v2334_v44 = vpop.permute.xlu1 %2333 }
 0xdc2   :  { %4416 = vmatpush3.xpose.msk.msra.mxu1 %vm338_vm6, %v2334_v44 }
 0xdc3   :  { %4425 = vmatprep.subr.mxu1 %v4754_v58 }
 0xdc5   :  { %4418 = vmatmul.mubr.msk.f32.vlgmr.msra.gmra.mrb[26].mxu1 %vm338_vm6, %v5201_v31 }
 0xdc6   :  { %4427 = vmatprep.mubr.msk.f32.mxu1 %vm4755_vm5, %v4754_v58 }
 0xe24   :  { %v2486_v45 = vpop.permute.xlu1 %2485 }
 0xe25   :  { %4426 = vmatpush3.xpose.msk.msra.mxu1 %vm338_vm6, %v2486_v45  ;;  %v2410_v46 = vpop.permute.xlu0 %2409 }
 0xe26   :  { %4421 = vmatpush3.xpose.msk.msra.mxu0 %vm338_vm6, %v2410_v46  ;;  %4435 = vmatprep.subr.mxu1 %v4754_v58 }
 0xe27   :  { %4430 = vmatprep.subr.mxu0 %v4754_v58 }
 0xe28   :  { %4428 = vmatmul.mubr.msk.f32.vlgmr.msra.gmra.mrb[28].mxu1 %vm338_vm6, %v5221_v51 }
 0xe29   :  { %4423 = vmatmul.mubr.msk.f32.vlgmr.msra.gmra.mrb[20].mxu0 %vm338_vm6, %v5225_v38  ;;  %v2562_v47 = vpop.permute.xlu0 %2561  ;;  %4437 = vmatprep.mubr.msk.f32.mxu1 %vm4755_vm5, %v4754_v58 }
 0xe2a   :  { %4431 = vmatpush3.xpose.msk.msra.mxu0 %vm338_vm6, %v2562_v47  ;;  %4432 = vmatprep.mubr.msk.f32.mxu0 %vm4755_vm5, %v4754_v58 }
 0xe2b   :  { %4440 = vmatprep.subr.mxu0 %v4754_v58 }
 0xe2c   :  { %v2638_v49 = vpop.permute.xlu1 %2637 }
 0xe2d   :  { %4433 = vmatmul.mubr.msk.f32.vlgmr.msra.gmra.mrb[22].mxu0 %vm338_vm6, %v5229_v39  ;;  %4436 = vmatpush3.xpose.msk.msra.mxu1 %vm338_vm6, %v2638_v49  ;;  %v2714_v53 = vpop.permute.xlu0 %2713 }
 0xe2e   :  { %4441 = vmatpush3.xpose.msk.msra.mxu0 %vm338_vm6, %v2714_v53  ;;  %4442 = vmatprep.mubr.msk.f32.mxu0 %vm4755_vm5, %v4754_v58 }
 0xe2f   :  { %4445 = vmatprep.subr.mxu1 %v4754_v58  ;;  %4450 = vmatprep.subr.mxu0 %v4754_v58 }
 0xe30   :  { %v2790_v57 = vpop.permute.xlu1 %2789  ;;  %4438 = vmatmul.mubr.msk.f32.vlgmr.msra.gmra.mrb[30].mxu1 %vm338_vm6, %v5235_v41 }
 0xe31   :  { %4443 = vmatmul.mubr.msk.f32.vlgmr.msra.gmra.mrb[24].mxu0 %vm338_vm6, %v5231_v40  ;;  %4446 = vmatpush3.xpose.msk.msra.mxu1 %vm338_vm6, %v2790_v57 }
 0xe32   :  { %4447 = vmatprep.mubr.msk.f32.mxu1 %vm4755_vm5, %v4754_v58  ;;  %4455 = vmatprep.subr.mxu1 %v4754_v58 }
 0xe33   :  { %4452 = vmatprep.mubr.msk.f32.mxu0 %vm4755_vm5, %v4754_v58 }
 0xe34   :  { %4448 = vmatmul.mubr.msk.f32.vlgmr.msra.gmra.mrb[32].mxu1 %vm338_vm6, %v5243_v43 }
 0xe35   :  { %4457 = vmatprep.mubr.msk.f32.mxu1 %vm4755_vm5, %v4754_v58 }
 0xe91   :  { %v2329_v34 = vpop.f32.mrb[24].mxu1 }
 0xe92   :  { %v4414_v59 = vpop.f32.mrb[25].mxu1  ;;  %v2865_v60 = vsel %vm338_vm6, %v2329_v34, -inf }
 0xe93   :  { %2866 = vmax.xlane.f32.xlu0 %v2865_v60 }
 0xe98   :  { %v2405_v61 = vpop.f32.mrb[26].mxu1 }
 0xe99   :  { %v4419_v62 = vpop.f32.mrb[27].mxu1  ;;  %v2868_v1 = vsel %vm338_vm6, %v2405_v61, -inf }
 0xe9a   :  { %2869 = vmax.xlane.f32.xlu1 %v2868_v1 }
 0xefb   :  { %v2557_v2 = vpop.f32.mrb[28].mxu1 }
 0xefc   :  { %v2481_v5 = vpop.f32.mrb[20].mxu0  ;;  %v4429_v6 = vpop.f32.mrb[29].mxu1  ;;  %v2874_v7 = vsel %vm338_vm6, %v2557_v2, -inf }
 0xefd   :  { %2875 = vmax.xlane.f32.xlu0 %v2874_v7  ;;  %v4424_v8 = vpop.f32.mrb[21].mxu0  ;;  %v2871_v10 = vsel %vm338_vm6, %v2481_v5, -inf }
 0xf00   :  { %v2633_v9 = vpop.f32.mrb[22].mxu0 }
 0xf01   :  { %2872 = vmax.xlane.f32.xlu0 %v2871_v10  ;;  %v4434_v11 = vpop.f32.mrb[23].mxu0  ;;  %v2877_v18 = vsel %vm338_vm6, %v2633_v9, -inf }
 0xf03   :  { %v2709_v14 = vpop.f32.mrb[30].mxu1 }
 0xf04   :  { %v4439_v15 = vpop.f32.mrb[31].mxu1  ;;  %v2785_v16 = vpop.f32.mrb[24].mxu0  ;;  %v2880_v17 = vsel %vm338_vm6, %v2709_v14, -inf }
 0xf05   :  { %2881 = vmax.xlane.f32.xlu1 %v2880_v17  ;;  %2878 = vmax.xlane.f32.xlu0 %v2877_v18  ;;  %v4444_v19 = vpop.f32.mrb[25].mxu0  ;;  %v2883_v24 = vsel %vm338_vm6, %v2785_v16, -inf }
 0xf07   :  { %v2861_v20 = vpop.f32.mrb[32].mxu1 }
 0xf08   :  { %v4449_v21 = vpop.f32.mrb[33].mxu1  ;;  %v2886_v22 = vsel %vm338_vm6, %v2861_v20, -inf }
 0xf09   :  { %2887 = vmax.xlane.f32.xlu1 %v2886_v22  ;;  %2884 = vmax.xlane.f32.xlu0 %v2883_v24 }
 0xf1a   :  { %3029 = vrot.lane.b32.xlu1 %v5201_v31, %s4760_s20 }
 0xf1e   :  { %3105 = vrot.lane.b32.xlu1 %v5225_v38, %s4760_s20 }
 0xf1f   :  { %2953 = vrot.lane.b32.xlu0 %v5205_v48, %s4760_s20 }
 0xf20   :  { %v2867_v25 = vpop.xlane.xlu0 %2866 }
 0xf21   :  { %v2889_v27 = vsub.f32 %v2329_v34, %v2867_v25 }
 0xf22   :  { %3181 = vrot.lane.b32.xlu1 %v5221_v51, %s4760_s20 }
 0xf23   :  { %3257 = vrot.lane.b32.xlu0 %v5229_v39, %s4760_s20  ;;  %v2897_v28 = vmul.f32 1.442695, %v2889_v27 }
 0xf25   :  { %4690 = vpow2.f32 %v2897_v28 }
 0xf26   :  { %3333 = vrot.lane.b32.xlu1 %v5235_v41, %s4760_s20 }
 0xf27   :  { %v2870_v30 = vpop.xlane.xlu1 %2869 }
 0xf28   :  { %v2890_v32 = vsub.f32 %v2405_v61, %v2870_v30 }
 0xf2a   :  { %v2899_v33 = vmul.f32 1.442695, %v2890_v32 }
 0xf2c   :  { %4692 = vpow2.f32 %v2899_v33 }
 0xf2f   :  { %v5313_v3 = vpop.eup %4690 }
 0xf30   :  { %v2913_v35 = vsel %vm338_vm6, %v5313_v3, 0.0 }
 0xf36   :  { %v5317_v36 = vpop.eup %4692 }
 0xf37   :  { %v2916_v37 = vsel %vm338_vm6, %v5317_v36, 0.0 }
 0xf42   :  { %2914 = vadd.xlane.f32.xlu0 %v2913_v35 }
 0xf4a   :  { %2917 = vadd.xlane.f32.xlu1 %v2916_v37 }
 0xf8a   :  { %v2876_v29 = vpop.xlane.xlu0 %2875 }
 0xf8b   :  { %v2892_v31 = vsub.f32 %v2557_v2, %v2876_v29 }
 0xf8d   :  { %v2903_v48 = vmul.f32 1.442695, %v2892_v31 }
 0xf8e   :  { %v2873_v51 = vpop.xlane.xlu0 %2872 }
 0xf8f   :  { %4694 = vpow2.f32 %v2903_v48  ;;  %v2891_v38 = vsub.f32 %v2481_v5, %v2873_v51 }
 0xf91   :  { %v2901_v39 = vmul.f32 1.442695, %v2891_v38 }
 0xf92   :  { %v2882_v41 = vpop.xlane.xlu1 %2881  ;;  %v2879_v42 = vpop.xlane.xlu0 %2878 }
 0xf93   :  { %4696 = vpow2.f32 %v2901_v39  ;;  %v2894_v44 = vsub.f32 %v2709_v14, %v2882_v41  ;;  %v2893_v45 = vsub.f32 %v2633_v9, %v2879_v42 }
 0xf95   :  { %v2907_v46 = vmul.f32 1.442695, %v2894_v44  ;;  %v2905_v47 = vmul.f32 1.442695, %v2893_v45 }
 0xf96   :  { %v2888_v49 = vpop.xlane.xlu1 %2887  ;;  %v2885_v53 = vpop.xlane.xlu0 %2884 }
 0xf97   :  { %4698 = vpow2.f32 %v2907_v46  ;;  %v2896_v57 = vsub.f32 %v2861_v20, %v2888_v49  ;;  %v2895_v34 = vsub.f32 %v2785_v16, %v2885_v53 }
 0xf98   :  { %4700 = vpow2.f32 %v2905_v47 }
 0xf99   :  { %v4695_v59 = vpop.eup %4694  ;;  %v2911_v60 = vmul.f32 1.442695, %v2896_v57  ;;  %v2909_v61 = vmul.f32 1.442695, %v2895_v34 }
 0xf9a   :  { %v3030_v62 = vpop.permute.xlu1 %3029  ;;  %v2954_v1 = vpop.permute.xlu0 %2953  ;;  %v2922_v2 = vsel %vm338_vm6, %v4695_v59, 0.0 }
 0xf9b   :  { %4702 = vpow2.f32 %v2911_v60  ;;  %4456 = vmatpush3.msra.mxu1 %v3030_v62  ;;  %2923 = vadd.xlane.f32.xlu1 %v2922_v2 }
 0xf9c   :  { %4704 = vpow2.f32 %v2909_v61  ;;  %4451 = vmatpush3.msra.mxu0 %v2954_v1  ;;  %4465 = vmatprep.subr.mxu1 %v4754_v58 }
 0xf9d   :  { %v4697_v5 = vpop.eup %4696  ;;  %4460 = vmatprep.subr.mxu0 %v4754_v58 }
 0xf9e   :  { %v2919_v6 = vsel %vm338_vm6, %v4697_v5, 0.0  ;;  %v3106_v17 = vpop.permute.xlu1 %3105  ;;  %v3258_v18 = vpop.permute.xlu0 %3257 }
 0xf9f   :  { %2920 = vadd.xlane.f32.xlu0 %v2919_v6 }
 0xfa1   :  { %v4699_v7 = vpop.eup %4698 }
 0xfa2   :  { %v4701_v8 = vpop.eup %4700  ;;  %v2928_v9 = vsel %vm338_vm6, %v4699_v7, 0.0  ;;  %v3182_v19 = vpop.permute.xlu1 %3181 }
 0xfa3   :  { %2929 = vadd.xlane.f32.xlu1 %v2928_v9  ;;  %v2925_v10 = vsel %vm338_vm6, %v4701_v8, 0.0 }
 0xfa4   :  { %2926 = vadd.xlane.f32.xlu0 %v2925_v10 }
 0xfa5   :  { %v5327_v11 = vpop.eup %4702 }
 0xfa6   :  { %v5329_v14 = vpop.eup %4704  ;;  %v2934_v15 = vsel %vm338_vm6, %v5327_v11, 0.0  ;;  %v3334_v21 = vpop.permute.xlu1 %3333 }
 0xfa7   :  { %2935 = vadd.xlane.f32.xlu1 %v2934_v15  ;;  %v2931_v16 = vsel %vm338_vm6, %v5329_v14, 0.0 }
 0xfa8   :  { %2932 = vadd.xlane.f32.xlu0 %v2931_v16 }
 0xfb8   :  { %3485 = vrot.lane.b32.xlu1 %v5243_v43, %s4760_s20 }
 0xfbe   :  { %3409 = vrot.lane.b32.xlu0 %v5231_v40, %s4760_s20 }
 0xfcf   :  { %v2915_v20 = vpop.xlane.xlu0 %2914 }
 0xfd0   :  { %4706 = vrcp.f32 %v2915_v20 }
 0xfd7   :  { %v2918_v22 = vpop.xlane.xlu1 %2917 }
 0xfd8   :  { %4708 = vrcp.f32 %v2918_v22 }
 0xfda   :  { %v4707_v24 = vpop.eup %4706 }
 0xfdb   :  { %v2945_v25 = vmul.f32 %v4707_v24, %v5313_v3 }
 0xfdd   :  { %4453 = vmatmul.mubr.msk.f32.vlgmr.msra.gmra.mrb[26].mxu0 %vm338_vm6, %v2945_v25 }
 0xfde   :  { %4461 = vmatpush3.msra.mxu0 %v3106_v17  ;;  %4462 = vmatprep.mubr.msk.f32.mxu0 %vm4755_vm5, %v4754_v58 }
 0xfdf   :  { %4470 = vmatprep.subr.mxu0 %v4754_v58 }
 0xfe2   :  { %v4709_v40 = vpop.eup %4708 }
 0xfe3   :  { %v2946_v43 = vmul.f32 %v4709_v40, %v5317_v36 }
 0xfe5   :  { %4458 = vmatmul.mubr.msk.f32.vlgmr.msra.gmra.mrb[34].mxu1 %vm338_vm6, %v2946_v43 }
 0xfe6   :  { %4466 = vmatpush3.msra.mxu1 %v3182_v19  ;;  %4467 = vmatprep.mubr.msk.f32.mxu1 %vm4755_vm5, %v4754_v58 }
 0xfe7   :  { %4475 = vmatprep.subr.mxu1 %v4754_v58 }
0x1028   :  { %v2924_v27 = vpop.xlane.xlu1 %2923 }
0x1029   :  { %4710 = vrcp.f32 %v2924_v27 }
0x102c   :  { %v2921_v28 = vpop.xlane.xlu0 %2920 }
0x102d   :  { %4712 = vrcp.f32 %v2921_v28 }
0x1030   :  { %v2930_v30 = vpop.xlane.xlu1 %2929 }
0x1031   :  { %4714 = vrcp.f32 %v2930_v30  ;;  %v2927_v32 = vpop.xlane.xlu0 %2926 }
0x1032   :  { %4716 = vrcp.f32 %v2927_v32 }
0x1033   :  { %v4711_v33 = vpop.eup %4710 }
0x1034   :  { %v2948_v3 = vmul.f32 %v4711_v33, %v4695_v59  ;;  %v2936_v35 = vpop.xlane.xlu1 %2935  ;;  %v4764_v33 = vmov 0  }
0x1035   :  { %4718 = vrcp.f32 %v2936_v35  ;;  %v2933_v36 = vpop.xlane.xlu0 %2932  ;;  %4633 = vset.pattern.permute.xlu1 %v4764_v33  ;;  %4632 = vset.pattern.permute.xlu0 %v4764_v33 }
0x1036   :  { %4720 = vrcp.f32 %v2933_v36  ;;  %4468 = vmatmul.mubr.msk.f32.vlgmr.msra.gmra.mrb[36].mxu1 %vm338_vm6, %v2948_v3 }
0x1037   :  { %v4713_v37 = vpop.eup %4712  ;;  %4476 = vmatpush3.msra.mxu1 %v3334_v21  ;;  %4477 = vmatprep.mubr.msk.f32.mxu1 %vm4755_vm5, %v4754_v58  ;;  %v4034_v21 = vld [vmem:[%s5536_s3 + $0x7] ss:$0 sm:$0xff] }
0x1038   :  { %v2947_v29 = vmul.f32 %v4713_v37, %v4697_v5  ;;  %4485 = vmatprep.subr.mxu1 %v4754_v58  ;;  %v3486_v39 = vpop.permute.xlu1 %3485  ;;  %v114_v43 = vmul.f32 %v4034_v21, %v4820_v13  ;;  %v2039_v30 = vmul.f32 %v4034_v21, %v5180_v56  ;;  %v5409_v37 = vld [vmem:[%s5536_s3 + $0x9] ss:$0 sm:$0xff] }
0x1039   :  { %v3410_v42 = vpop.permute.xlu0 %3409 }
0x103a   :  { %4463 = vmatmul.mubr.msk.f32.vlgmr.msra.gmra.mrb[28].mxu0 %vm338_vm6, %v2947_v29  ;;  %v118_v28 = vsel %vm27_vm0, %v114_v43, 0.0  ;;  %v2043_v32 = vsel %vm27_vm0, %v2039_v30, 0.0 }
0x103b   :  { %v4715_v31 = vpop.eup %4714  ;;  %4471 = vmatpush3.msra.mxu0 %v3258_v18  ;;  %4472 = vmatprep.mubr.msk.f32.mxu0 %vm4755_vm5, %v4754_v58 }
0x103c   :  { %v4717_v48 = vpop.eup %4716  ;;  %v2950_v51 = vmul.f32 %v4715_v31, %v4699_v7  ;;  %4480 = vmatprep.subr.mxu0 %v4754_v58 }
0x103d   :  { %v2949_v38 = vmul.f32 %v4717_v48, %v4701_v8 }
0x103e   :  { %4478 = vmatmul.mubr.msk.f32.vlgmr.msra.gmra.mrb[38].mxu1 %vm338_vm6, %v2950_v51 }
0x103f   :  { %v4719_v41 = vpop.eup %4718  ;;  %4473 = vmatmul.mubr.msk.f32.vlgmr.msra.gmra.mrb[30].mxu0 %vm338_vm6, %v2949_v38  ;;  %4486 = vmatpush3.msra.mxu1 %v3486_v39 }
0x1040   :  { %v4721_v44 = vpop.eup %4720  ;;  %v2952_v45 = vmul.f32 %v4719_v41, %v5327_v11  ;;  %4481 = vmatpush3.msra.mxu0 %v3410_v42  ;;  %4482 = vmatprep.mubr.msk.f32.mxu0 %vm4755_vm5, %v4754_v58 }
0x1041   :  { %v2951_v46 = vmul.f32 %v4721_v44, %v5329_v14  ;;  %4487 = vmatprep.mubr.msk.f32.mxu1 %vm4755_vm5, %v4754_v58  ;;  %4588 = vmatprep.subr.bf16.mxu0 %v5044_v63 }
0x1042   :  { %4488 = vmatmul.mubr.msk.f32.vlgmr.msra.gmra.mrb[40].mxu1 %vm338_vm6, %v2952_v45  ;;  %4596 = vmatprep.subr.bf16.mxu1 %v5099_v52 }
0x1043   :  { %4483 = vmatmul.mubr.msk.f32.vlgmr.msra.gmra.mrb[32].mxu0 %vm338_vm6, %v2951_v46  ;;  %4598 = vmatpush3.bf16.msra.mxu1 %v5099_v52  ;;  %v113_v46 = vmul.f32 %v4034_v21, %v4818_v12 }
0x1044   :  { %4590 = vmatpush3.bf16.msra.mxu0 %v5044_v63  ;;  %4600 = vmatprep.subr.bf16.mxu1 %v5104_v54 }
0x1045   :  { %4592 = vmatprep.subr.bf16.mxu0 %v5054_v4 }
0x1047   :  { %4602 = vmatpush3.bf16.msra.mxu1 %v5104_v54 }
0x1048   :  { %4594 = vmatpush3.bf16.msra.mxu0 %v5054_v4 }
0x10b0   :  { %v3025_v47 = vpop.f32.mrb[26].mxu0 }
0x10b1   :  { %v4454_v49 = vpop.f32.mrb[27].mxu0 }
0x10b2   :  { %v115_v49 = vsel %vm27_vm0, %v113_v46, 0.0 }
0x10b8   :  { %v3101_v53 = vpop.f32.mrb[34].mxu1 }
0x10b9   :  { %v4459_v57 = vpop.f32.mrb[35].mxu1 }
0x1109   :  { %v3253_v34 = vpop.f32.mrb[36].mxu1 }
0x110a   :  { %3565 = vrot.lane.b32.xlu1 %v3253_v34, %s4761_s29  ;;  %v4469_v59 = vpop.f32.mrb[37].mxu1 }
0x110d   :  { %v3177_v60 = vpop.f32.mrb[28].mxu0 }
0x110e   :  { %3563 = vrot.lane.b32.xlu0 %v3177_v60, %s4761_s29  ;;  %v4464_v63 = vpop.f32.mrb[29].mxu0 }
0x1111   :  { %v3405_v52 = vpop.f32.mrb[38].mxu1 }
0x1112   :  { %v3329_v61 = vpop.f32.mrb[30].mxu0  ;;  %3573 = vrot.lane.b32.xlu1 %v3405_v52, %s4762_s30  ;;  %v4479_v62 = vpop.f32.mrb[39].mxu1 }
0x1113   :  { %3571 = vrot.lane.b32.xlu0 %v3329_v61, %s4762_s30  ;;  %v4474_v4 = vpop.f32.mrb[31].mxu0 }
0x1115   :  { %v3557_v54 = vpop.f32.mrb[40].mxu1 }
0x1116   :  { %v3481_v1 = vpop.f32.mrb[32].mxu0  ;;  %3581 = vrot.lane.b32.xlu1 %v3557_v54, %s4763_s0  ;;  %v4489_v2 = vpop.f32.mrb[41].mxu1 }
0x1117   :  { %3579 = vrot.lane.b32.xlu0 %v3481_v1, %s4763_s0  ;;  %v4484_v5 = vpop.f32.mrb[33].mxu0 }
0x117c   :  { %v3566_v6 = vpop.permute.xlu1 %3565 }
0x117d   :  { %v3586_v10 = vsel %vm338_vm6, %v3101_v53, %v3566_v6  ;;  %v2038_v53 = vmul.f32 %v4034_v21, %v5183_v0 }
0x117f   :  { %v2040_v59 = vsel %vm27_vm0, %v2038_v53, 0.0 }
0x1180   :  { %v3564_v7 = vpop.permute.xlu0 %3563 }
0x1181   :  { %v3585_v11 = vsel %vm338_vm6, %v3025_v47, %v3564_v7 }
0x1184   :  { %v3574_v8 = vpop.permute.xlu1 %3573 }
0x1185   :  { %v3572_v9 = vpop.permute.xlu0 %3571  ;;  %v3588_v14 = vsel %vm1667_vm7, %v3586_v10, %v3574_v8 }
0x1186   :  { %v3587_v16 = vsel %vm1667_vm7, %v3585_v11, %v3572_v9 }
0x1188   :  { %v3582_v15 = vpop.permute.xlu1 %3581 }
0x1189   :  { %v3590_v17 = vsel %vm1670_vm8, %v3588_v14, %v3582_v15  ;;  %v3580_v18 = vpop.permute.xlu0 %3579 }
0x118a   :  { %v3589_v19 = vsel %vm1670_vm8, %v3587_v16, %v3580_v18 }
0x118b   :  { %4498 = vmatprep.mubr.msk.f32.mxu0 %vm27_vm0, %v3589_v19 }
0x118c   :  { %4499 = vmatmul.mubr.msk.f32.vlgmr.msra.gmra.mrb[34].mxu0 %vm27_vm0, %v3590_v17 }
0x125f   :  { %v4500_v20 = vpop.f32.mrb[34].mxu0 }
0x1260   :  { %v5393_v22 = vadd.f32 %v4500_v20, %v5180_v56  ;;  %v3667_v24 = vpop.f32.mrb[35].mxu0 }
0x1261   :  { %v5396_v25 = vadd.f32 %v3667_v24, %v5183_v0 }
0x1262   :  { %v3683_v40 = vsel %vm27_vm0, %v5393_v22, 0.0 }
0x1263   :  { %3684 = vadd.xlane.f32.xlu1 %v3683_v40  ;;  %v3680_v27 = vsel %vm27_vm0, %v5396_v25, 0.0 }
0x1264   :  { %3681 = vadd.xlane.f32.xlu0 %v3680_v27 }
0x1267   :  { %119 = vadd.xlane.f32.xlu1 %v118_v28 }
0x126b   :  { %2044 = vadd.xlane.f32.xlu1 %v2043_v32 }
0x12f0   :  { %v3685_v3 = vpop.xlane.xlu1 %3684 }
0x12f1   :  { %v3687_v35 = vmul.f32 0.03125, %v3685_v3  ;;  %v3682_v36 = vpop.xlane.xlu0 %3681 }
0x12f2   :  { %v3686_v13 = vmul.f32 0.03125, %v3682_v36 }
0x12f3   :  { %v5412_v29 = vsub.f32 %v5393_v22, %v3687_v35 }
0x12f4   :  { %v5415_v56 = vsub.f32 %v5396_v25, %v3686_v13  ;;  %v120_v31 = vpop.xlane.xlu1 %119 }
0x12f5   :  { %v126_v48 = vadd.f32 %v5409_v37, %v120_v31  ;;  %v3691_v42 = vmul.f32 %v5412_v29, %v5412_v29 }
0x12f6   :  { %v3690_v51 = vmul.f32 %v5415_v56, %v5415_v56 }
0x12f7   :  { %v4037_v38 = vmul.f32 -1.442695, %v126_v48  ;;  %v3695_v45 = vsel %vm27_vm0, %v3691_v42, 0.0 }
0x12f8   :  { %v2045_v39 = vpop.xlane.xlu1 %2044  ;;  %v3692_v41 = vsel %vm27_vm0, %v3690_v51, 0.0 }
0x12f9   :  { %4722 = vpow2.f32 %v4037_v38  ;;  %3693 = vadd.xlane.f32.xlu0 %v3692_v41  ;;  %v2047_v44 = vadd.f32 %v5409_v37, %v2045_v39 }
0x12fb   :  { %v4083_v47 = vmul.f32 -1.442695, %v2047_v44 }
0x12fd   :  { %3696 = vadd.xlane.f32.xlu0 %v3695_v45  ;;  %4724 = vpow2.f32 %v4083_v47 }
0x1301   :  { %116 = vadd.xlane.f32.xlu0 %v115_v49 }
0x1303   :  { %v4723_v57 = vpop.eup %4722 }
0x1304   :  { %v134_v34 = vadd.f32 1.0, %v4723_v57 }
0x1305   :  { %2041 = vadd.xlane.f32.xlu0 %v2040_v59  ;;  %v3723_v59 = vmul.f32 %v5132_v23, %v5412_v29 }
0x1306   :  { %4726 = vrcp.f32 %v134_v34 }
0x1307   :  { %v4725_v60 = vpop.eup %4724 }
0x1308   :  { %v2055_v52 = vadd.f32 1.0, %v4725_v60 }
0x130a   :  { %4728 = vrcp.f32 %v2055_v52 }
0x1310   :  { %v4727_v63 = vpop.eup %4726 }
0x1311   :  { %vm147_vm3 = vcmp.gt.f32.partialorder %v4727_v63, 0.9  ;;  %vm155_vm4 = vcmp.le.f32.partialorder %v4727_v63, 0.9 }
0x1312   :  { %v4039_v12 = vsel %vm147_vm3, 1.0, %v4754_v58  ;;  %v4041_v61 = vsel %vm155_vm4, 1.0, %v4754_v58 }
0x1313   :  { %v163_v62 = vmul.f32 %v4727_v63, %v4041_v61  ;;  %v179_v4 = vadd.f32 %v4041_v61, %v4039_v12 }
0x1314   :  { %v4729_v5 = vpop.eup %4728 }
0x1315   :  { %v167_v0 = vsub.f32 1.0, %v163_v62 }
0x1317   :  { %v169_v54 = vmul.f32 %v4039_v12, %v167_v0 }
0x1319   :  { %v173_v1 = vmul.f32 %v4039_v12, %v169_v54 }
0x131b   :  { %v5431_v2 = vadd.f32 %v173_v1, %v163_v62 }
0x131d   :  { %2012 = vperm.xlu1 %4633, %v5431_v2   ;;  %vm2061_vm5 = vcmp.lt.f32.partialorder %v5431_v2, 1.0 }
0x131e   :  { %v4085_v6 = vsel %vm2061_vm5, 1.0, %v4754_v58 }
0x131f   :  { %v2067_v7 = vmul.f32 %v4729_v5, %v4085_v6 }
0x1321   :  { %v2069_v8 = vadd.f32 %v2067_v7, %v5431_v2 }
0x1323   :  { %vm2071_vm6 = vcmp.gt.f32.partialorder %v2069_v8, 0.9  ;;  %vm2079_vm7 = vcmp.le.f32.partialorder %v2069_v8, 0.9 }
0x1324   :  { %v4087_v9 = vsel %vm2071_vm6, 1.0, %v4754_v58  ;;  %v4089_v10 = vsel %vm2079_vm7, 1.0, %v4754_v58  ;;  %vm4022_vm6 = vcmask 269312   ;;  %vm4025_vm7 = vcmask 277504  }
0x1325   :  { %v2085_v11 = vmul.f32 %v4089_v10, %v4085_v6  ;;  %v5439_v14 = vmul.f32 %v4087_v9, %v4085_v6  ;;  %v2018_v9 = vsub.f32 1.0, %v5431_v2 }
0x1327   :  { %v5441_v15 = vmul.f32 %v4729_v5, %v2085_v11  ;;  %v2097_v16 = vadd.f32 %v2085_v11, %v179_v4 }
0x1329   :  { %v2089_v17 = vadd.f32 %v5441_v15, %v5431_v2  ;;  %v5446_v18 = vadd.f32 %v2097_v16, %v5439_v14 }
0x132b   :  { %v2091_v19 = vsub.f32 1.0, %v2089_v17 }
0x132d   :  { %v2093_v20 = vmul.f32 %v2091_v19, %v5439_v14 }
0x132f   :  { %v5449_v21 = vadd.f32 %v2093_v20, %v169_v54 }
0x1386   :  { %v3694_v24 = vpop.xlane.xlu0 %3693 }
0x1387   :  { %v3698_v40 = vmul.f32 0.032258064, %v3694_v24 }
0x1389   :  { %4730 = vrsqrt.f32 %v3698_v40  ;;  %vm3702_vm8 = vcmp.eq.f32.partialorder %v3698_v40, inf  ;;  %v3705_v36 = vand.u32 2147483648, %v3698_v40  ;;  %vm3704_vm9 = vcmp.eq.f32.partialorder %v3698_v40, 0.0 }
0x138a   :  { %v3697_v43 = vpop.xlane.xlu0 %3696 }
0x138b   :  { %v3699_v27 = vmul.f32 0.032258064, %v3697_v43 }
0x138d   :  { %4732 = vrsqrt.f32 %v3699_v27  ;;  %vm3709_vm10 = vcmp.eq.f32.partialorder %v3699_v27, inf  ;;  %v3712_v41 = vand.u32 2147483648, %v3699_v27  ;;  %vm3711_vm11 = vcmp.eq.f32.partialorder %v3699_v27, 0.0 }
0x138e   :  { %v117_v28 = vpop.xlane.xlu0 %116 }
0x138f   :  { %v125_v30 = vadd.f32 %v5409_v37, %v117_v28 }
0x1391   :  { %v4036_v32 = vmul.f32 -1.442695, %v125_v30 }
0x1392   :  { %v2042_v33 = vpop.xlane.xlu0 %2041 }
0x1393   :  { %v4731_v3 = vpop.eup %4730  ;;  %4734 = vpow2.f32 %v4036_v32  ;;  %v2046_v13 = vadd.f32 %v5409_v37, %v2042_v33  ;;  %v3722_v37 = vmul.f32 %v5132_v23, %v5415_v56  ;;  %v2101_v33 = vmul.f32 %v5449_v21, %v5439_v14  ;;  %v3826_v14 = vld [vmem:[%s5533_s2 + $0x70] sm:$0xff] }
0x1394   :  { %v3701_v35 = vmul.f32 %v4731_v3, %v3698_v40 }
0x1395   :  { %v4082_v42 = vmul.f32 -1.442695, %v2046_v13  ;;  %v3825_v13 = vld [vmem:[%s5533_s2 + $0x48] sm:$0xff] }
0x1396   :  { %v3703_v31 = vsel %vm3702_vm8, %v3698_v40, %v3701_v35 }
0x1397   :  { %v4733_v48 = vpop.eup %4732  ;;  %v3706_v51 = vsel %vm3704_vm9, %v3705_v36, %v3703_v31  ;;  %v3824_v36 = vld [vmem:[%s5533_s2 + $0x20] sm:$0xff] }
0x1398   :  { %v3708_v38 = vmul.f32 %v4733_v48, %v3699_v27  ;;  %v3714_v39 = vadd.f32 1e-06, %v3706_v51  ;;  %v4603_v31 = vpack.c.bf16 %v3825_v13, %v3824_v36  ;;  %v3828_v51 = vld [vmem:[%s5533_s2 + $0xc0] sm:$0xff] }
0x139a   :  { %v3710_v44 = vsel %vm3709_vm10, %v3699_v27, %v3708_v38  ;;  %4736 = vrcp.f32 %v3714_v39  ;;  %v3829_v38 = vld [vmem:[%s5533_s2 + $0xe8] sm:$0xff]  ;;  %4604 = vmatprep.subr.bf16.mxu0 %v4603_v31 }
0x139b   :  { %v3713_v45 = vsel %vm3711_vm11, %v3712_v41, %v3710_v44  ;;  %4738 = vpow2.f32 %v4082_v42  ;;  %4606 = vmatpush3.bf16.msra.mxu0 %v4603_v31  ;;  %v4611_v39 = vpack.c.bf16 %v3829_v38, %v3828_v51  ;;  %v3830_v41 = vld [vmem:[%s5533_s2 + $0x110] sm:$0xff]  ;;  %v3831_v42 = vld [vmem:[%s5533_s2 + $0x138] sm:$0xff] }
0x139c   :  { %v3715_v46 = vadd.f32 1e-06, %v3713_v45  ;;  %v4615_v44 = vpack.c.bf16 %v3831_v42, %v3830_v41  ;;  %v4122_v45 = vld [vmem:[%s5536_s3 + $0x8] ss:$0 sm:$0xff]  ;;  %v4128_v42 = vld [vmem:[%s5536_s3 + $0x4] ss:$0 sm:$0xff] }
0x139d   :  { %v4735_v47 = vpop.eup %4734 }
0x139e   :  { %4740 = vrcp.f32 %v3715_v46  ;;  %v133_v49 = vadd.f32 1.0, %v4735_v47 }
0x13a0   :  { %4742 = vrcp.f32 %v133_v49 }
0x13a4   :  { %v4737_v53 = vpop.eup %4736 }
0x13a5   :  { %v3724_v57 = vmul.f32 %v4737_v53, %v3722_v37  ;;  %v4739_v34 = vpop.eup %4738 }
0x13a6   :  { %v2054_v61 = vadd.f32 1.0, %v4739_v34  ;;  %v2013_v34 = vpop.permute.xlu1 %2012 }
0x13a7   :  { %v3730_v60 = vadd.f32 %v5138_v26, %v3724_v57 }
0x13a8   :  { %v4741_v63 = vpop.eup %4740  ;;  %4744 = vrcp.f32 %v2054_v61 }
0x13a9   :  { %v3725_v52 = vmul.f32 %v4741_v63, %v3723_v59  ;;  %4509 = vmatprep.mubr.msk.f32.mxu1 %vm27_vm0, %v3730_v60 }
0x13aa   :  { %v4743_v12 = vpop.eup %4742 }
0x13ab   :  { %v3731_v62 = vadd.f32 %v5138_v26, %v3725_v52  ;;  %vm146_vm12 = vcmp.gt.f32.partialorder %v4743_v12, 0.9  ;;  %vm154_vm14 = vcmp.le.f32.partialorder %v4743_v12, 0.9 }
0x13ac   :  { %v4038_v56 = vsel %vm146_vm12, 1.0, %v4754_v58  ;;  %v4040_v4 = vsel %vm154_vm14, 1.0, %v4754_v58 }
0x13ad   :  { %4510 = vmatmul.mubr.msk.f32.vlgmr.msra.gmra.mrb[42].mxu1 %vm27_vm0, %v3731_v62  ;;  %v162_v0 = vmul.f32 %v4743_v12, %v4040_v4  ;;  %v178_v23 = vadd.f32 %v4040_v4, %v4038_v56 }
0x13af   :  { %v166_v29 = vsub.f32 1.0, %v162_v0 }
0x13b1   :  { %v168_v54 = vmul.f32 %v4038_v56, %v166_v29 }
0x13b2   :  { %v4745_v7 = vpop.eup %4744 }
0x13b3   :  { %v172_v1 = vmul.f32 %v4038_v56, %v168_v54 }
0x13b5   :  { %v174_v5 = vadd.f32 %v172_v1, %v162_v0  ;;  %v4127_v0 = vld [vmem:[%s5536_s3 + $0x6] ss:$0 sm:$0xff] }
0x13b7   :  { %2007 = vperm.xlu0 %4632, %v174_v5   ;;  %v2017_v6 = vsub.f32 1.0, %v174_v5  ;;  %vm2060_vm15 = vcmp.lt.f32.partialorder %v174_v5, 1.0 }
0x13b8   :  { %v4084_v26 = vsel %vm2060_vm15, 1.0, %v4754_v58 }
0x13b9   :  { %2021 = vperm.xlu1 %4633, %v2017_v6   ;;  %v2066_v8 = vmul.f32 %v4745_v7, %v4084_v26 }
0x13bb   :  { %v2068_v10 = vadd.f32 %v2066_v8, %v174_v5 }
0x13bd   :  { %2026 = vperm.xlu1 %4633, %v2018_v9   ;;  %vm2070_vm1 = vcmp.gt.f32.partialorder %v2068_v10, 0.9  ;;  %vm2078_vm2 = vcmp.le.f32.partialorder %v2068_v10, 0.9 }
0x13be   :  { %v4086_v11 = vsel %vm2070_vm1, 1.0, %v4754_v58  ;;  %v4088_v16 = vsel %vm2078_vm2, 1.0, %v4754_v58  ;;  %v2103_v58 = vadd.f32 %v2101_v33, %v5441_v15  ;;  %v3827_v15 = vld [vmem:[%s5533_s2 + $0x98] sm:$0xff] }
0x13bf   :  { %v2084_v17 = vmul.f32 %v4088_v16, %v4084_v26  ;;  %v2076_v19 = vmul.f32 %v4086_v11, %v4084_v26  ;;  %v4607_v48 = vpack.c.bf16 %v3827_v15, %v3826_v14 }
0x13c0   :  { %v3935_v35 = vsub.f32 1.0, %v2103_v58 }
0x13c1   :  { %v2086_v20 = vmul.f32 %v4745_v7, %v2084_v17  ;;  %v2096_v24 = vadd.f32 %v2084_v17, %v178_v23  ;;  %4608 = vmatprep.subr.bf16.mxu0 %v4607_v48  ;;  %v2016_v23 = vmul.f32 %v2013_v34, %v5172_v50 }
0x13c2   :  { %4610 = vmatpush3.bf16.msra.mxu0 %v4607_v48 }
0x13c3   :  { %v2088_v40 = vadd.f32 %v2086_v20, %v174_v5  ;;  %v5467_v43 = vadd.f32 %v2096_v24, %v2076_v19  ;;  %4612 = vmatprep.subr.bf16.mxu0 %v4611_v39 }
0x13c5   :  { %v2090_v27 = vsub.f32 1.0, %v2088_v40 }
0x13c6   :  { %4614 = vmatpush3.bf16.msra.mxu0 %v4611_v39 }
0x13c7   :  { %v2092_v28 = vmul.f32 %v2090_v27, %v2076_v19  ;;  %4616 = vmatprep.subr.bf16.mxu0 %v4615_v44 }
0x13c9   :  { %v5469_v30 = vadd.f32 %v2092_v28, %v168_v54 }
0x13ca   :  { %4618 = vmatpush3.bf16.msra.mxu0 %v4615_v44 }
0x13cb   :  { %v2100_v2 = vmul.f32 %v5469_v30, %v2076_v19 }
0x13cd   :  { %v2102_v32 = vadd.f32 %v2100_v2, %v2086_v20 }
0x13cf   :  { %3924 = vperm.xlu1 %4633, %v2102_v32   ;;  %v3934_v3 = vsub.f32 1.0, %v2102_v32 }
0x13d3   :  { %3929 = vperm.xlu1 %4633, %v2103_v58  }
0x13d7   :  { %3938 = vperm.xlu1 %4633, %v3934_v3  }
0x13db   :  { %3943 = vperm.xlu1 %4633, %v3935_v35  }
0x1436   :  { %v2008_v61 = vpop.permute.xlu0 %2007 }
0x1437   :  { %v2015_v1 = vmul.f32 %v2008_v61, %v5177_v55 }
0x1438   :  { %v2022_v59 = vpop.permute.xlu1 %2021 }
0x1439   :  { %v2029_v56 = vmul.f32 0.0, %v2022_v59 }
0x143b   :  { %v2031_v8 = vadd.f32 %v2029_v56, %v2015_v1 }
0x143c   :  { %v2027_v60 = vpop.permute.xlu1 %2026 }
0x143d   :  { %v2030_v62 = vmul.f32 0.0, %v2027_v60 }
0x143f   :  { %v2032_v7 = vadd.f32 %v2030_v62, %v2016_v23 }
0x144e   :  { %v3925_v63 = vpop.permute.xlu1 %3924 }
0x1452   :  { %v3930_v52 = vpop.permute.xlu1 %3929 }
0x1456   :  { %v3939_v12 = vpop.permute.xlu1 %3938 }
0x1457   :  { %v3946_v16 = vmul.f32 %v3939_v12, %v2031_v8 }
0x145a   :  { %v3944_v5 = vpop.permute.xlu1 %3943 }
0x145b   :  { %v3947_v10 = vmul.f32 %v3944_v5, %v2032_v7 }
0x1480   :  { %v4511_v46 = vpop.f32.mrb[42].mxu1 }
0x1481   :  { %v3819_v47 = vadd.f32 %v4511_v46, %v4122_v45  ;;  %v3813_v49 = vpop.f32.mrb[43].mxu1 }
0x1482   :  { %v3814_v37 = vadd.f32 %v4122_v45, %v3813_v49  ;;  %v4129_v49 = vld [vmem:[%s5536_s3 + $0x5] ss:$0 sm:$0xff] }
0x1483   :  { %v3823_v57 = vmax.f32 %v3819_v47, 0.0 }
0x1484   :  { %v3822_v53 = vmax.f32 %v3814_v37, 0.0 }
0x1486   :  { %4528 = vmatprep.mubr.msk.f32.mxu0 %vm1914_vm13, %v3822_v53 }
0x1487   :  { %4529 = vmatmul.mubr.msk.f32.vlgmr.msra.gmra.mrb[36].mxu0 %vm1914_vm13, %v3823_v57 }
0x155a   :  { %v4530_v4 = vpop.f32.mrb[36].mxu0 }
0x155b   :  { %v3914_v29 = vadd.f32 %v4530_v4, %v5393_v22  ;;  %v3904_v54 = vpop.f32.mrb[37].mxu0 }
0x155c   :  { %v3913_v6 = vadd.f32 %v3904_v54, %v5396_v25 }
0x155d   :  { %v3921_v26 = vadd.f32 %v4127_v0, %v3914_v29 }
0x155e   :  { %v3920_v9 = vadd.f32 %v4127_v0, %v3913_v6 }
0x155f   :  { %v3933_v11 = vmul.f32 %v3930_v52, %v3921_v26 }
0x1560   :  { %v3932_v17 = vmul.f32 %v3925_v63, %v3920_v9 }
0x1561   :  { %v3949_v19 = vadd.f32 %v3947_v10, %v3933_v11 }
0x1562   :  { %v3948_v20 = vadd.f32 %v3946_v16, %v3932_v17 }
0x1563   :  { %v3955_v50 = vsel %vm27_vm0, %v3949_v19, 0.0 }
0x1564   :  { %3956 = vadd.xlane.f32.xlu0 %v3955_v50  ;;  %v3952_v22 = vsel %vm27_vm0, %v3948_v20, 0.0 }
0x1565   :  { %3953 = vadd.xlane.f32.xlu1 %v3952_v22 }
0x15f1   :  { %v3957_v55 = vpop.xlane.xlu0 %3956 }
0x15f2   :  { %v3959_v24 = vmul.f32 0.03125, %v3957_v55  ;;  %v3954_v40 = vpop.xlane.xlu1 %3953 }
0x15f3   :  { %v3958_v25 = vmul.f32 0.03125, %v3954_v40 }
0x15f4   :  { %v3961_v27 = vsub.f32 %v3949_v19, %v3959_v24 }
0x15f5   :  { %v3960_v28 = vsub.f32 %v3948_v20, %v3958_v25 }
0x15f6   :  { %v3963_v2 = vmul.f32 %v3961_v27, %v3961_v27  ;;  %v3995_v44 = vmul.f32 %v4128_v42, %v3961_v27 }
0x15f7   :  { %v3962_v32 = vmul.f32 %v3960_v28, %v3960_v28  ;;  %v3994_v47 = vmul.f32 %v4128_v42, %v3960_v28 }
0x15f8   :  { %v3967_v33 = vsel %vm27_vm0, %v3963_v2, 0.0 }
0x15f9   :  { %3968 = vadd.xlane.f32.xlu1 %v3967_v33  ;;  %v3964_v58 = vsel %vm27_vm0, %v3962_v32, 0.0 }
0x15fa   :  { %3965 = vadd.xlane.f32.xlu0 %v3964_v58 }
0x160a   :  { %4008 = vrot.lane.b32.xlu1 %v5449_v21, %s4765_s22 }
0x160e   :  { %4014 = vrot.lane.b32.xlu1 %v5467_v43, %s4766_s23 }
0x1610   :  { %4006 = vrot.lane.b32.xlu0 %v5469_v30, %s4765_s22 }
0x1614   :  { %4016 = vrot.lane.b32.xlu0 %v5446_v18, %s4766_s23 }
0x1686   :  { %v3969_v3 = vpop.xlane.xlu1 %3968 }
0x1687   :  { %v3971_v35 = vmul.f32 0.032258064, %v3969_v3  ;;  %v3966_v36 = vpop.xlane.xlu0 %3965 }
0x1688   :  { %v3970_v13 = vmul.f32 0.032258064, %v3966_v36 }
0x1689   :  { %4746 = vrsqrt.f32 %v3971_v35  ;;  %vm3981_vm13 = vcmp.eq.f32.partialorder %v3971_v35, inf  ;;  %v3984_v48 = vand.u32 2147483648, %v3971_v35  ;;  %vm3983_vm3 = vcmp.eq.f32.partialorder %v3971_v35, 0.0 }
0x168a   :  { %4748 = vrsqrt.f32 %v3970_v13  ;;  %vm3974_vm4 = vcmp.eq.f32.partialorder %v3970_v13, inf  ;;  %v3977_v43 = vand.u32 2147483648, %v3970_v13  ;;  %vm3976_vm5 = vcmp.eq.f32.partialorder %v3970_v13, 0.0  ;;  %v4009_v37 = vpop.permute.xlu1 %4008 }
0x168b   :  { %v4007_v45 = vpop.permute.xlu0 %4006 }
0x168e   :  { %v4015_v61 = vpop.permute.xlu1 %4014 }
0x168f   :  { %v4017_v52 = vpop.permute.xlu0 %4016 }
0x1693   :  { %v4747_v14 = vpop.eup %4746 }
0x1694   :  { %v4749_v31 = vpop.eup %4748  ;;  %v3980_v15 = vmul.f32 %v4747_v14, %v3971_v35 }
0x1695   :  { %v3973_v51 = vmul.f32 %v4749_v31, %v3970_v13 }
0x1696   :  { %v3982_v21 = vsel %vm3981_vm13, %v3971_v35, %v3980_v15 }
0x1697   :  { %v3975_v38 = vsel %vm3974_vm4, %v3970_v13, %v3973_v51  ;;  %v3985_v30 = vsel %vm3983_vm3, %v3984_v48, %v3982_v21 }
0x1698   :  { %v3987_v18 = vadd.f32 1e-06, %v3985_v30  ;;  %v3978_v39 = vsel %vm3976_vm5, %v3977_v43, %v3975_v38 }
0x1699   :  { %v3986_v41 = vadd.f32 1e-06, %v3978_v39 }
0x169a   :  { %4750 = vrcp.f32 %v3987_v18 }
0x169b   :  { %4752 = vrcp.f32 %v3986_v41 }
0x16a4   :  { %v4751_v46 = vpop.eup %4750 }
0x16a5   :  { %v4753_v53 = vpop.eup %4752  ;;  %v3997_v57 = vmul.f32 %v4751_v46, %v3995_v44 }
0x16a6   :  { %v3996_v34 = vmul.f32 %v4753_v53, %v3994_v47 }
0x16a7   :  { %v4003_v59 = vadd.f32 %v4129_v49, %v3997_v57 }
0x16a8   :  { %v4002_v60 = vadd.f32 %v4129_v49, %v3996_v34 }
0x16a9   :  { %v4021_v63 = vsel %vm27_vm0, %v4003_v59, %v4009_v37 }
0x16aa   :  { %v4020_v12 = vsel %vm27_vm0, %v4002_v60, %v4007_v45  ;;  %v4024_v62 = vsel %vm4022_vm6, %v4021_v63, %v4017_v52 }
0x16ab   :  { %v4023_v56 = vsel %vm4022_vm6, %v4020_v12, %v4015_v61  ;;  %4027 = vst.msk [vmem:[%s5537_s4 + $0x8] sm:$0xff] %vm4025_vm7, %v4024_v62 }
0x16ac   :  { %4026 = vst.msk [vmem:[%s5537_s4] sm:$0xff] %vm4025_vm7, %v4023_v56 }

</bundles_post_ra>
